<compile_context>
chip_gen: v7x
topology: tpu7x:2x2x1
jax: 0.10.0
libtpu: 0.0.40
codegen_flags: <defaults>
</compile_context>

<pallas_src>
import functools

import numpy as np
import jax
import jax.numpy as jnp
from jax.experimental import pallas as pl
from jax.experimental.pallas import tpu as pltpu


# ----------------------------- Pallas kernel -------------------------------

def _make_fused_lstm_fc_kernel(T, B_pad, d_pads, H, num_layers, awe, O):
    """Fused kernel: num_layers LSTM layers (wavefront) + final FC.

    Ref order (all VMEM):
      x_ref                    (T*B_pad, d_pads[0])   time-major, batch padded
      w_ref[l], l=0..L-1       (d_pads[l] + H, 4H)    [W_ih^T ; W_hh^T], mxu dt
      b_ref                    (L, 4H)  f32           fused b_ih + b_hh
      fc_ref                   (awe*H + 1, O)         [fc_w^T ; fc_b], mxu dt
      out_ref                  (B_pad, O) f32
      gx_scr (scratch)         (T*B_pad, 4H) f32      layer-0 input projection
    """

    def kernel(*refs):
        x_ref = refs[0]
        w_refs = refs[1:1 + num_layers]
        b_ref = refs[1 + num_layers]
        fc_ref = refs[2 + num_layers]
        out_ref = refs[3 + num_layers]
        gx_scr = refs[4 + num_layers]

        mxu_dt = x_ref.dtype

        # ---- hoisted loop-invariants ------------------------------------
        # Single-tanh gate nonlinearity:
        #   i/f/o lanes: sigmoid(x) = 0.5*tanh(0.5*x) + 0.5
        #   g lanes    : tanh(x)    = 1.0*tanh(1.0*x) + 0.0
        lane = jax.lax.broadcasted_iota(jnp.int32, (B_pad, 4 * H), 1)
        is_g = (lane >= 2 * H) & (lane < 3 * H)
        g_scale = jnp.where(is_g, 1.0, 0.5).astype(jnp.float32)
        g_shift = jnp.where(is_g, 0.0, 0.5).astype(jnp.float32)

        # Per-layer weight slices + pre-broadcast biases (JAX does not CSE
        # broadcast_in_dim, so never broadcast inside the unrolled loop).
        w_ih, w_hh, b_full = [], [], []
        for l in range(num_layers):
            d = d_pads[l]
            w_ih.append(w_refs[l][0:d, :])
            w_hh.append(w_refs[l][d:d + H, :])
            b_full.append(jnp.broadcast_to(b_ref[l:l + 1, :], (B_pad, 4 * H)))

        # ---- layer-0 input projection hoisted out of the recurrence ------
        # One well-shaped (T*B_pad, D) x (D, 4H) MXU matmul; parked in VMEM
        # scratch so the unrolled loop only keeps one (B_pad, 4H) slice live.
        gx_scr[...] = (
            jnp.dot(x_ref[...], w_ih[0], preferred_element_type=jnp.float32)
            + b_ref[0:1, :])

        # ---- wavefront recurrence -----------------------------------------
        # Wave w runs layer l at timestep t = w - l; all steps within a wave
        # are mutually independent (read the previous wave's h snapshot).
        h = [jnp.zeros((B_pad, H), jnp.float32) for _ in range(num_layers)]
        c = [jnp.zeros((B_pad, H), jnp.float32) for _ in range(num_layers)]
        fc_partials = []
        for wave in range(T + num_layers - 1):
            h_prev = list(h)                       # snapshot (trace-time only)
            for l in range(num_layers):
                t = wave - l
                if not (0 <= t < T):
                    continue
                if l == 0:
                    row = t * B_pad                # tile-aligned static offset
                    gates = gx_scr[row:row + B_pad, :] + jnp.dot(
                        h_prev[0].astype(mxu_dt), w_hh[0],
                        preferred_element_type=jnp.float32)
                else:
                    gates = (jnp.dot(h_prev[l - 1].astype(mxu_dt), w_ih[l],
                                     preferred_element_type=jnp.float32)
                             + jnp.dot(h_prev[l].astype(mxu_dt), w_hh[l],
                                       preferred_element_type=jnp.float32)
                             + b_full[l])
                # one tanh pass for all four gates
                act = jnp.tanh(gates * g_scale) * g_scale + g_shift
                i_g = act[:, 0 * H:1 * H]
                f_g = act[:, 1 * H:2 * H]
                g_g = act[:, 2 * H:3 * H]
                o_g = act[:, 3 * H:4 * H]
                c[l] = f_g * c[l] + i_g * g_g
                h[l] = o_g * jnp.tanh(c[l])
                # FC fused into the top layer's loop: issue the partial matmul
                # as soon as h_t exists; partials are independent accumulators.
                if l == num_layers - 1 and t >= T - awe:
                    a = t - (T - awe)
                    fc_partials.append(jnp.dot(
                        h[l].astype(mxu_dt), fc_ref[a * H:(a + 1) * H, :],
                        preferred_element_type=jnp.float32))

        # pairwise (tree) sum of the independent FC partials + bias
        while len(fc_partials) > 1:
            nxt = [fc_partials[i] + fc_partials[i + 1]
                   for i in range(0, len(fc_partials) - 1, 2)]
            if len(fc_partials) % 2:
                nxt.append(fc_partials[-1])
            fc_partials = nxt
        fc_bias = fc_ref[awe * H:awe * H + 1, :].astype(jnp.float32)   # (1, O)
        out_ref[...] = fc_partials[0] + fc_bias

    return kernel


# ------------------------------ wrappers ------------------------------------

def _round_up(x, m):
    return ((x + m - 1) // m) * m


def prepare_params(params, fc_w, fc_b, mxu_dtype=jnp.bfloat16):
    """One-time weight preparation (transpose, pad, pack, bias fusion).

    Default mxu_dtype=bf16: native MXU dtype on v5e/v6e/v7x (f32 matmuls are
    decomposed into multiple bf16 passes), halves weight DMA/VMEM bytes.
    State and accumulation stay f32 in the kernel.  Use mxu_dtype=jnp.float32
    for a strict (1e-3) match against the f32 reference.
    """
    layer_ws = []
    biases = []
    for (w_ih, w_hh, b_ih, b_hh) in params:
        four_h, d_in = w_ih.shape
        H = four_h // 4
        assert H % 8 == 0, "hidden_dim must be a multiple of 8 (sublane tile)"
        d_pad = _round_up(d_in, 8)
        w_ih_t = jnp.pad(jnp.transpose(w_ih), ((0, d_pad - d_in), (0, 0)))
        w_hh_t = jnp.transpose(w_hh)
        layer_ws.append(jnp.concatenate([w_ih_t, w_hh_t], axis=0)
                        .astype(mxu_dtype))                  # (d_pad+H, 4H)
        biases.append((b_ih + b_hh).astype(jnp.float32))
    biases = jnp.stack(biases, axis=0)                        # (L, 4H) f32
    fc_packed = jnp.concatenate([jnp.transpose(fc_w), fc_b[None, :]],
                                axis=0).astype(mxu_dtype)     # (awe*H+1, O)
    return tuple(layer_ws), biases, fc_packed


@functools.partial(jax.jit, static_argnames=("awe",))
def lstm_forward(X, prepared, *, awe):
    """Mirrors LSTM.forward with self.k is None (no TBPTT), eval semantics."""
    layer_ws, biases, fc_packed = prepared
    num_layers = len(layer_ws)
    H = biases.shape[1] // 4
    O = fc_packed.shape[1]
    mxu_dtype = layer_ws[0].dtype

    if X.ndim == 2:
        X = X[None]                                   # torch.unsqueeze(X, 0)
    B, T, D = X.shape
    # If T < awe, the PyTorch module would also fail at the Linear layer.
    assert T >= awe, "seq_len must be >= awe (matches PyTorch failure mode)"

    d_pad0 = layer_ws[0].shape[0] - H
    d_pads = (d_pad0,) + (H,) * (num_layers - 1)

    # Pad batch to a multiple of 8 sublanes; all in-kernel slices tile-align.
    B_pad = _round_up(B, 8)
    # TODO(synk): at production T*B*D, fold this transpose/pad/reshape into a
    # T-chunk grid instead of materializing a second copy of X in HBM.
    x_tm = jnp.transpose(X.astype(jnp.float32), (1, 0, 2))    # (T, B, D)
    x_tm = jnp.pad(x_tm, ((0, 0), (0, B_pad - B), (0, d_pad0 - D)))
    x_flat = x_tm.reshape(T * B_pad, d_pad0).astype(mxu_dtype)

    kernel = _make_fused_lstm_fc_kernel(T=T, B_pad=B_pad, d_pads=d_pads, H=H,
                                        num_layers=num_layers, awe=awe, O=O)

    flat_args = [x_flat, *layer_ws, biases, fc_packed]        # 5 DMAs (L=2)
    out_pad = pl.pallas_call(
        kernel,
        out_shape=jax.ShapeDtypeStruct((B_pad, O), jnp.float32),
        in_specs=[pl.BlockSpec(memory_space=pltpu.MemorySpace.VMEM)]
                 * len(flat_args),
        out_specs=pl.BlockSpec(memory_space=pltpu.MemorySpace.VMEM),
        scratch_shapes=[pltpu.VMEM((T * B_pad, 4 * H), jnp.float32)],
        compiler_params=pltpu.CompilerParams(
            vmem_limit_bytes=32 * 1024 * 1024),
    )(*flat_args)
    return out_pad[:B]


def init_params(key, input_size, hidden_dim, num_layers, awe, output_size):
    """Deterministic synthetic params, PyTorch-shaped (W: (4H, D), b: (4H,))."""
    params = []
    k = 1.0 / np.sqrt(hidden_dim)
    for layer in range(num_layers):
        d_in = input_size if layer == 0 else hidden_dim
        key, k1, k2, k3, k4 = jax.random.split(key, 5)
        w_ih = jax.random.uniform(k1, (4 * hidden_dim, d_in), jnp.float32, -k, k)
        w_hh = jax.random.uniform(k2, (4 * hidden_dim, hidden_dim), jnp.float32, -k, k)
        b_ih = jax.random.uniform(k3, (4 * hidden_dim,), jnp.float32, -k, k)
        b_hh = jax.random.uniform(k4, (4 * hidden_dim,), jnp.float32, -k, k)
        params.append((w_ih, w_hh, b_ih, b_hh))
    kf = 1.0 / np.sqrt(hidden_dim * awe)
    key, k1, k2 = jax.random.split(key, 3)
    fc_w = jax.random.uniform(k1, (output_size, hidden_dim * awe), jnp.float32, -kf, kf)
    fc_b = jax.random.uniform(k2, (output_size,), jnp.float32, -kf, kf)
    return params, fc_w, fc_b


# --------------------------- pure-JAX reference -----------------------------

def lstm_forward_ref(X, params, fc_w, fc_b, awe, hidden_dim):
    if X.ndim == 2:
        X = X[None]
    X = X.astype(jnp.float32)
    B, T, _ = X.shape
    inp = X
    for (w_ih, w_hh, b_ih, b_hh) in params:
        H = hidden_dim
        w_ih_t, w_hh_t, b = w_ih.T, w_hh.T, b_ih + b_hh

        def step(carry, x_t):
            h, c = carry
            gates = x_t @ w_ih_t + h @ w_hh_t + b
            i = jax.nn.sigmoid(gates[:, :H])
            f = jax.nn.sigmoid(gates[:, H:2 * H])
            g = jnp.tanh(gates[:, 2 * H:3 * H])
            o = jax.nn.sigmoid(gates[:, 3 * H:])
            c = f * c + i * g
            h = o * jnp.tanh(c)
            return (h, c), h

        h0 = jnp.zeros((B, H), jnp.float32)
        c0 = jnp.zeros((B, H), jnp.float32)
        _, hsq = jax.lax.scan(step, (h0, c0), jnp.transpose(inp, (1, 0, 2)))
        inp = jnp.transpose(hsq, (1, 0, 2))
    start = max(0, T - awe)
    length = min(awe, T)
    flat = inp[:, start:start + length, :].reshape(B, length * hidden_dim)
    return flat @ fc_w.T + fc_b


# ---------------------------------- main ------------------------------------

if __name__ == "__main__":
    input_size = 16
    hidden_dim = 32
    num_layers = 2
    awe = 4
    output_size = 8
    batch = 2
    seq_len = 8

    key = jax.random.PRNGKey(0)
    key, kx, kp = jax.random.split(key, 3)
    X = jax.random.normal(kx, (batch, seq_len, input_size), jnp.float32)
    params, fc_w, fc_b = init_params(kp, input_size, hidden_dim,
                                     num_layers, awe, output_size)

    ref = jax.block_until_ready(
        lstm_forward_ref(X, params, fc_w, fc_b, awe, hidden_dim))

    # Strict-precision path (f32 MXU inputs): must match the reference tightly.
    prep_f32 = prepare_params(params, fc_w, fc_b, mxu_dtype=jnp.float32)
    out_f32 = jax.block_until_ready(lstm_forward(X, prep_f32, awe=awe))
    assert out_f32.shape == (batch, output_size), out_f32.shape
    err_f32 = float(jnp.max(jnp.abs(out_f32 - ref)))
    assert err_f32 < 1e-3, f"f32 mismatch vs reference: {err_f32}"

    # Default perf path (bf16 MXU inputs, f32 state/accumulation): recurrent
    # rounding accumulates over T and layers, so validate a looser tolerance.
    prep_bf16 = prepare_params(params, fc_w, fc_b)            # bf16 default
    out_bf16 = jax.block_until_ready(lstm_forward(X, prep_bf16, awe=awe))
    assert out_bf16.shape == (batch, output_size), out_bf16.shape
    err_bf16 = float(jnp.max(jnp.abs(out_bf16 - ref)))
    assert err_bf16 < 3e-2, f"bf16 mismatch vs reference: {err_bf16}"

    print("KERNEL_OK")
</pallas_src>

<mosaic_0001>
module attributes {stable_mosaic.version = 11 : i64} {
  func.func @kernel(%arg0: memref<64x16xf32, #tpu.memory_space<vmem>>, %arg1: memref<48x128xf32, #tpu.memory_space<vmem>>, %arg2: memref<64x128xf32, #tpu.memory_space<vmem>>, %arg3: memref<2x128xf32, #tpu.memory_space<vmem>>, %arg4: memref<129x8xf32, #tpu.memory_space<vmem>>, %arg5: memref<8x8xf32, #tpu.memory_space<vmem>>, %arg6: memref<64x128xf32, #tpu.memory_space<vmem>>) attributes {dimension_semantics = [], scalar_prefetch = 0 : i64, scratch_operands = 1 : i64, tpu.core_type = #tpu.core_type<tc>} {
    %0 = tpu.iota {dimensions = array<i32: 1>} : vector<8x128xi32>
    %c64_i32 = arith.constant 64 : i32
    %1 = vector.broadcast %c64_i32 : i32 to vector<8x128xi32>
    %2 = arith.cmpi sge, %0, %1 : vector<8x128xi32>
    %c96_i32 = arith.constant 96 : i32
    %3 = vector.broadcast %c96_i32 : i32 to vector<8x128xi32>
    %4 = arith.cmpi slt, %0, %3 : vector<8x128xi32>
    %5 = arith.andi %2, %4 : vector<8x128xi1>
    %cst = arith.constant 1.000000e+00 : f32
    %cst_0 = arith.constant 5.000000e-01 : f32
    %6 = vector.broadcast %cst : f32 to vector<8x128xf32>
    %7 = vector.broadcast %cst_0 : f32 to vector<8x128xf32>
    %8 = arith.select %5, %6, %7 : vector<8x128xi1>, vector<8x128xf32>
    %cst_1 = arith.constant 0.000000e+00 : f32
    %cst_2 = arith.constant 5.000000e-01 : f32
    %9 = vector.broadcast %cst_1 : f32 to vector<8x128xf32>
    %10 = vector.broadcast %cst_2 : f32 to vector<8x128xf32>
    %11 = arith.select %5, %9, %10 : vector<8x128xi1>, vector<8x128xf32>
    %c0 = arith.constant 0 : index
    %c0_3 = arith.constant 0 : index
    %12 = vector.load %arg1[%c0, %c0_3] : memref<48x128xf32, #tpu.memory_space<vmem>>, vector<16x128xf32>
    %c16 = arith.constant 16 : index
    %c0_4 = arith.constant 0 : index
    %13 = vector.load %arg1[%c16, %c0_4] : memref<48x128xf32, #tpu.memory_space<vmem>>, vector<32x128xf32>
    %c0_5 = arith.constant 0 : index
    %c0_6 = arith.constant 0 : index
    %14 = vector.load %arg2[%c0_5, %c0_6] : memref<64x128xf32, #tpu.memory_space<vmem>>, vector<32x128xf32>
    %c32 = arith.constant 32 : index
    %c0_7 = arith.constant 0 : index
    %15 = vector.load %arg2[%c32, %c0_7] : memref<64x128xf32, #tpu.memory_space<vmem>>, vector<32x128xf32>
    %c1 = arith.constant 1 : index
    %c0_8 = arith.constant 0 : index
    %16 = vector.load %arg3[%c1, %c0_8] : memref<2x128xf32, #tpu.memory_space<vmem>>, vector<1x128xf32>
    %17 = vector.shape_cast %16 : vector<1x128xf32> to vector<1x128xf32>
    %18 = vector.broadcast %17 : vector<1x128xf32> to vector<8x128xf32>
    %c0_9 = arith.constant 0 : index
    %c0_10 = arith.constant 0 : index
    %19 = vector.load %arg0[%c0_9, %c0_10] : memref<64x16xf32, #tpu.memory_space<vmem>>, vector<64x16xf32>
    %cst_11 = arith.constant dense<0.000000e+00> : vector<64x128xf32>
    %20 = tpu.matmul %19, %12, %cst_11 {dimension_numbers = #tpu.dot_dimension_numbers<[1], [0], [0], [1], [0, 0, 1, 1], [], []>} : vector<64x16xf32>, vector<16x128xf32>, vector<64x128xf32> -> vector<64x128xf32>
    %c0_12 = arith.constant 0 : index
    %c0_13 = arith.constant 0 : index
    %21 = vector.load %arg3[%c0_12, %c0_13] : memref<2x128xf32, #tpu.memory_space<vmem>>, vector<1x128xf32>
    %22 = vector.broadcast %21 : vector<1x128xf32> to vector<64x128xf32>
    %23 = arith.addf %20, %22 : vector<64x128xf32>
    %c0_14 = arith.constant 0 : index
    %c0_15 = arith.constant 0 : index
    %24 = vector.load %arg6[%c0_14, %c0_15] : memref<64x128xf32, #tpu.memory_space<vmem>>, vector<64x128xf32>
    tpu.vector_store %arg6[%c0_14, %c0_15], %23 {strides = array<i32>} : memref<64x128xf32, #tpu.memory_space<vmem>>, vector<64x128xf32>,
    %cst_16 = arith.constant 0.000000e+00 : f32
    %25 = vector.broadcast %cst_16 : f32 to vector<8x32xf32>
    %cst_17 = arith.constant 0.000000e+00 : f32
    %26 = vector.broadcast %cst_17 : f32 to vector<8x32xf32>
    %cst_18 = arith.constant 0.000000e+00 : f32
    %27 = vector.broadcast %cst_18 : f32 to vector<8x32xf32>
    %cst_19 = arith.constant 0.000000e+00 : f32
    %28 = vector.broadcast %cst_19 : f32 to vector<8x32xf32>
    %c0_20 = arith.constant 0 : index
    %c0_21 = arith.constant 0 : index
    %29 = vector.load %arg6[%c0_20, %c0_21] : memref<64x128xf32, #tpu.memory_space<vmem>>, vector<8x128xf32>
    %cst_22 = arith.constant dense<0.000000e+00> : vector<8x128xf32>
    %30 = tpu.matmul %25, %13, %cst_22 {dimension_numbers = #tpu.dot_dimension_numbers<[1], [0], [0], [1], [0, 0, 1, 1], [], []>} : vector<8x32xf32>, vector<32x128xf32>, vector<8x128xf32> -> vector<8x128xf32>
    %31 = arith.addf %29, %30 : vector<8x128xf32>
    %32 = arith.mulf %31, %8 : vector<8x128xf32>
    %33 = math.tanh %32 : vector<8x128xf32>
    %34 = arith.mulf %33, %8 : vector<8x128xf32>
    %35 = arith.addf %34, %11 : vector<8x128xf32>
    %36 = vector.extract_strided_slice %35 {offsets = [0, 0], sizes = [8, 32], strides = [1, 1]} : vector<8x128xf32> to vector<8x32xf32>
    %37 = vector.extract_strided_slice %35 {offsets = [0, 32], sizes = [8, 32], strides = [1, 1]} : vector<8x128xf32> to vector<8x32xf32>
    %38 = vector.extract_strided_slice %35 {offsets = [0, 64], sizes = [8, 32], strides = [1, 1]} : vector<8x128xf32> to vector<8x32xf32>
    %39 = vector.extract_strided_slice %35 {offsets = [0, 96], sizes = [8, 32], strides = [1, 1]} : vector<8x128xf32> to vector<8x32xf32>
    %40 = arith.mulf %37, %27 : vector<8x32xf32>
    %41 = arith.mulf %36, %38 : vector<8x32xf32>
    %42 = arith.addf %40, %41 : vector<8x32xf32>
    %43 = math.tanh %42 : vector<8x32xf32>
    %44 = arith.mulf %39, %43 : vector<8x32xf32>
    %c8 = arith.constant 8 : index
    %c0_23 = arith.constant 0 : index
    %45 = vector.load %arg6[%c8, %c0_23] : memref<64x128xf32, #tpu.memory_space<vmem>>, vector<8x128xf32>
    %cst_24 = arith.constant dense<0.000000e+00> : vector<8x128xf32>
    %46 = tpu.matmul %44, %13, %cst_24 {dimension_numbers = #tpu.dot_dimension_numbers<[1], [0], [0], [1], [0, 0, 1, 1], [], []>} : vector<8x32xf32>, vector<32x128xf32>, vector<8x128xf32> -> vector<8x128xf32>
    %47 = arith.addf %45, %46 : vector<8x128xf32>
    %48 = arith.mulf %47, %8 : vector<8x128xf32>
    %49 = math.tanh %48 : vector<8x128xf32>
    %50 = arith.mulf %49, %8 : vector<8x128xf32>
    %51 = arith.addf %50, %11 : vector<8x128xf32>
    %52 = vector.extract_strided_slice %51 {offsets = [0, 0], sizes = [8, 32], strides = [1, 1]} : vector<8x128xf32> to vector<8x32xf32>
    %53 = vector.extract_strided_slice %51 {offsets = [0, 32], sizes = [8, 32], strides = [1, 1]} : vector<8x128xf32> to vector<8x32xf32>
    %54 = vector.extract_strided_slice %51 {offsets = [0, 64], sizes = [8, 32], strides = [1, 1]} : vector<8x128xf32> to vector<8x32xf32>
    %55 = vector.extract_strided_slice %51 {offsets = [0, 96], sizes = [8, 32], strides = [1, 1]} : vector<8x128xf32> to vector<8x32xf32>
    %56 = arith.mulf %53, %42 : vector<8x32xf32>
    %57 = arith.mulf %52, %54 : vector<8x32xf32>
    %58 = arith.addf %56, %57 : vector<8x32xf32>
    %59 = math.tanh %58 : vector<8x32xf32>
    %60 = arith.mulf %55, %59 : vector<8x32xf32>
    %cst_25 = arith.constant dense<0.000000e+00> : vector<8x128xf32>
    %61 = tpu.matmul %44, %14, %cst_25 {dimension_numbers = #tpu.dot_dimension_numbers<[1], [0], [0], [1], [0, 0, 1, 1], [], []>} : vector<8x32xf32>, vector<32x128xf32>, vector<8x128xf32> -> vector<8x128xf32>
    %cst_26 = arith.constant dense<0.000000e+00> : vector<8x128xf32>
    %62 = tpu.matmul %26, %15, %cst_26 {dimension_numbers = #tpu.dot_dimension_numbers<[1], [0], [0], [1], [0, 0, 1, 1], [], []>} : vector<8x32xf32>, vector<32x128xf32>, vector<8x128xf32> -> vector<8x128xf32>
    %63 = arith.addf %61, %62 : vector<8x128xf32>
    %64 = arith.addf %63, %18 : vector<8x128xf32>
    %65 = arith.mulf %64, %8 : vector<8x128xf32>
    %66 = math.tanh %65 : vector<8x128xf32>
    %67 = arith.mulf %66, %8 : vector<8x128xf32>
    %68 = arith.addf %67, %11 : vector<8x128xf32>
    %69 = vector.extract_strided_slice %68 {offsets = [0, 0], sizes = [8, 32], strides = [1, 1]} : vector<8x128xf32> to vector<8x32xf32>
    %70 = vector.extract_strided_slice %68 {offsets = [0, 32], sizes = [8, 32], strides = [1, 1]} : vector<8x128xf32> to vector<8x32xf32>
    %71 = vector.extract_strided_slice %68 {offsets = [0, 64], sizes = [8, 32], strides = [1, 1]} : vector<8x128xf32> to vector<8x32xf32>
    %72 = vector.extract_strided_slice %68 {offsets = [0, 96], sizes = [8, 32], strides = [1, 1]} : vector<8x128xf32> to vector<8x32xf32>
    %73 = arith.mulf %70, %28 : vector<8x32xf32>
    %74 = arith.mulf %69, %71 : vector<8x32xf32>
    %75 = arith.addf %73, %74 : vector<8x32xf32>
    %76 = math.tanh %75 : vector<8x32xf32>
    %77 = arith.mulf %72, %76 : vector<8x32xf32>
    %c16_27 = arith.constant 16 : index
    %c0_28 = arith.constant 0 : index
    %78 = vector.load %arg6[%c16_27, %c0_28] : memref<64x128xf32, #tpu.memory_space<vmem>>, vector<8x128xf32>
    %cst_29 = arith.constant dense<0.000000e+00> : vector<8x128xf32>
    %79 = tpu.matmul %60, %13, %cst_29 {dimension_numbers = #tpu.dot_dimension_numbers<[1], [0], [0], [1], [0, 0, 1, 1], [], []>} : vector<8x32xf32>, vector<32x128xf32>, vector<8x128xf32> -> vector<8x128xf32>
    %80 = arith.addf %78, %79 : vector<8x128xf32>
    %81 = arith.mulf %80, %8 : vector<8x128xf32>
    %82 = math.tanh %81 : vector<8x128xf32>
    %83 = arith.mulf %82, %8 : vector<8x128xf32>
    %84 = arith.addf %83, %11 : vector<8x128xf32>
    %85 = vector.extract_strided_slice %84 {offsets = [0, 0], sizes = [8, 32], strides = [1, 1]} : vector<8x128xf32> to vector<8x32xf32>
    %86 = vector.extract_strided_slice %84 {offsets = [0, 32], sizes = [8, 32], strides = [1, 1]} : vector<8x128xf32> to vector<8x32xf32>
    %87 = vector.extract_strided_slice %84 {offsets = [0, 64], sizes = [8, 32], strides = [1, 1]} : vector<8x128xf32> to vector<8x32xf32>
    %88 = vector.extract_strided_slice %84 {offsets = [0, 96], sizes = [8, 32], strides = [1, 1]} : vector<8x128xf32> to vector<8x32xf32>
    %89 = arith.mulf %86, %58 : vector<8x32xf32>
    %90 = arith.mulf %85, %87 : vector<8x32xf32>
    %91 = arith.addf %89, %90 : vector<8x32xf32>
    %92 = math.tanh %91 : vector<8x32xf32>
    %93 = arith.mulf %88, %92 : vector<8x32xf32>
    %cst_30 = arith.constant dense<0.000000e+00> : vector<8x128xf32>
    %94 = tpu.matmul %60, %14, %cst_30 {dimension_numbers = #tpu.dot_dimension_numbers<[1], [0], [0], [1], [0, 0, 1, 1], [], []>} : vector<8x32xf32>, vector<32x128xf32>, vector<8x128xf32> -> vector<8x128xf32>
    %cst_31 = arith.constant dense<0.000000e+00> : vector<8x128xf32>
    %95 = tpu.matmul %77, %15, %cst_31 {dimension_numbers = #tpu.dot_dimension_numbers<[1], [0], [0], [1], [0, 0, 1, 1], [], []>} : vector<8x32xf32>, vector<32x128xf32>, vector<8x128xf32> -> vector<8x128xf32>
    %96 = arith.addf %94, %95 : vector<8x128xf32>
    %97 = arith.addf %96, %18 : vector<8x128xf32>
    %98 = arith.mulf %97, %8 : vector<8x128xf32>
    %99 = math.tanh %98 : vector<8x128xf32>
    %100 = arith.mulf %99, %8 : vector<8x128xf32>
    %101 = arith.addf %100, %11 : vector<8x128xf32>
    %102 = vector.extract_strided_slice %101 {offsets = [0, 0], sizes = [8, 32], strides = [1, 1]} : vector<8x128xf32> to vector<8x32xf32>
    %103 = vector.extract_strided_slice %101 {offsets = [0, 32], sizes = [8, 32], strides = [1, 1]} : vector<8x128xf32> to vector<8x32xf32>
    %104 = vector.extract_strided_slice %101 {offsets = [0, 64], sizes = [8, 32], strides = [1, 1]} : vector<8x128xf32> to vector<8x32xf32>
    %105 = vector.extract_strided_slice %101 {offsets = [0, 96], sizes = [8, 32], strides = [1, 1]} : vector<8x128xf32> to vector<8x32xf32>
    %106 = arith.mulf %103, %75 : vector<8x32xf32>
    %107 = arith.mulf %102, %104 : vector<8x32xf32>
    %108 = arith.addf %106, %107 : vector<8x32xf32>
    %109 = math.tanh %108 : vector<8x32xf32>
    %110 = arith.mulf %105, %109 : vector<8x32xf32>
    %c24 = arith.constant 24 : index
    %c0_32 = arith.constant 0 : index
    %111 = vector.load %arg6[%c24, %c0_32] : memref<64x128xf32, #tpu.memory_space<vmem>>, vector<8x128xf32>
    %cst_33 = arith.constant dense<0.000000e+00> : vector<8x128xf32>
    %112 = tpu.matmul %93, %13, %cst_33 {dimension_numbers = #tpu.dot_dimension_numbers<[1], [0], [0], [1], [0, 0, 1, 1], [], []>} : vector<8x32xf32>, vector<32x128xf32>, vector<8x128xf32> -> vector<8x128xf32>
    %113 = arith.addf %111, %112 : vector<8x128xf32>
    %114 = arith.mulf %113, %8 : vector<8x128xf32>
    %115 = math.tanh %114 : vector<8x128xf32>
    %116 = arith.mulf %115, %8 : vector<8x128xf32>
    %117 = arith.addf %116, %11 : vector<8x128xf32>
    %118 = vector.extract_strided_slice %117 {offsets = [0, 0], sizes = [8, 32], strides = [1, 1]} : vector<8x128xf32> to vector<8x32xf32>
    %119 = vector.extract_strided_slice %117 {offsets = [0, 32], sizes = [8, 32], strides = [1, 1]} : vector<8x128xf32> to vector<8x32xf32>
    %120 = vector.extract_strided_slice %117 {offsets = [0, 64], sizes = [8, 32], strides = [1, 1]} : vector<8x128xf32> to vector<8x32xf32>
    %121 = vector.extract_strided_slice %117 {offsets = [0, 96], sizes = [8, 32], strides = [1, 1]} : vector<8x128xf32> to vector<8x32xf32>
    %122 = arith.mulf %119, %91 : vector<8x32xf32>
    %123 = arith.mulf %118, %120 : vector<8x32xf32>
    %124 = arith.addf %122, %123 : vector<8x32xf32>
    %125 = math.tanh %124 : vector<8x32xf32>
    %126 = arith.mulf %121, %125 : vector<8x32xf32>
    %cst_34 = arith.constant dense<0.000000e+00> : vector<8x128xf32>
    %127 = tpu.matmul %93, %14, %cst_34 {dimension_numbers = #tpu.dot_dimension_numbers<[1], [0], [0], [1], [0, 0, 1, 1], [], []>} : vector<8x32xf32>, vector<32x128xf32>, vector<8x128xf32> -> vector<8x128xf32>
    %cst_35 = arith.constant dense<0.000000e+00> : vector<8x128xf32>
    %128 = tpu.matmul %110, %15, %cst_35 {dimension_numbers = #tpu.dot_dimension_numbers<[1], [0], [0], [1], [0, 0, 1, 1], [], []>} : vector<8x32xf32>, vector<32x128xf32>, vector<8x128xf32> -> vector<8x128xf32>
    %129 = arith.addf %127, %128 : vector<8x128xf32>
    %130 = arith.addf %129, %18 : vector<8x128xf32>
    %131 = arith.mulf %130, %8 : vector<8x128xf32>
    %132 = math.tanh %131 : vector<8x128xf32>
    %133 = arith.mulf %132, %8 : vector<8x128xf32>
    %134 = arith.addf %133, %11 : vector<8x128xf32>
    %135 = vector.extract_strided_slice %134 {offsets = [0, 0], sizes = [8, 32], strides = [1, 1]} : vector<8x128xf32> to vector<8x32xf32>
    %136 = vector.extract_strided_slice %134 {offsets = [0, 32], sizes = [8, 32], strides = [1, 1]} : vector<8x128xf32> to vector<8x32xf32>
    %137 = vector.extract_strided_slice %134 {offsets = [0, 64], sizes = [8, 32], strides = [1, 1]} : vector<8x128xf32> to vector<8x32xf32>
    %138 = vector.extract_strided_slice %134 {offsets = [0, 96], sizes = [8, 32], strides = [1, 1]} : vector<8x128xf32> to vector<8x32xf32>
    %139 = arith.mulf %136, %108 : vector<8x32xf32>
    %140 = arith.mulf %135, %137 : vector<8x32xf32>
    %141 = arith.addf %139, %140 : vector<8x32xf32>
    %142 = math.tanh %141 : vector<8x32xf32>
    %143 = arith.mulf %138, %142 : vector<8x32xf32>
    %c32_36 = arith.constant 32 : index
    %c0_37 = arith.constant 0 : index
    %144 = vector.load %arg6[%c32_36, %c0_37] : memref<64x128xf32, #tpu.memory_space<vmem>>, vector<8x128xf32>
    %cst_38 = arith.constant dense<0.000000e+00> : vector<8x128xf32>
    %145 = tpu.matmul %126, %13, %cst_38 {dimension_numbers = #tpu.dot_dimension_numbers<[1], [0], [0], [1], [0, 0, 1, 1], [], []>} : vector<8x32xf32>, vector<32x128xf32>, vector<8x128xf32> -> vector<8x128xf32>
    %146 = arith.addf %144, %145 : vector<8x128xf32>
    %147 = arith.mulf %146, %8 : vector<8x128xf32>
    %148 = math.tanh %147 : vector<8x128xf32>
    %149 = arith.mulf %148, %8 : vector<8x128xf32>
    %150 = arith.addf %149, %11 : vector<8x128xf32>
    %151 = vector.extract_strided_slice %150 {offsets = [0, 0], sizes = [8, 32], strides = [1, 1]} : vector<8x128xf32> to vector<8x32xf32>
    %152 = vector.extract_strided_slice %150 {offsets = [0, 32], sizes = [8, 32], strides = [1, 1]} : vector<8x128xf32> to vector<8x32xf32>
    %153 = vector.extract_strided_slice %150 {offsets = [0, 64], sizes = [8, 32], strides = [1, 1]} : vector<8x128xf32> to vector<8x32xf32>
    %154 = vector.extract_strided_slice %150 {offsets = [0, 96], sizes = [8, 32], strides = [1, 1]} : vector<8x128xf32> to vector<8x32xf32>
    %155 = arith.mulf %152, %124 : vector<8x32xf32>
    %156 = arith.mulf %151, %153 : vector<8x32xf32>
    %157 = arith.addf %155, %156 : vector<8x32xf32>
    %158 = math.tanh %157 : vector<8x32xf32>
    %159 = arith.mulf %154, %158 : vector<8x32xf32>
    %cst_39 = arith.constant dense<0.000000e+00> : vector<8x128xf32>
    %160 = tpu.matmul %126, %14, %cst_39 {dimension_numbers = #tpu.dot_dimension_numbers<[1], [0], [0], [1], [0, 0, 1, 1], [], []>} : vector<8x32xf32>, vector<32x128xf32>, vector<8x128xf32> -> vector<8x128xf32>
    %cst_40 = arith.constant dense<0.000000e+00> : vector<8x128xf32>
    %161 = tpu.matmul %143, %15, %cst_40 {dimension_numbers = #tpu.dot_dimension_numbers<[1], [0], [0], [1], [0, 0, 1, 1], [], []>} : vector<8x32xf32>, vector<32x128xf32>, vector<8x128xf32> -> vector<8x128xf32>
    %162 = arith.addf %160, %161 : vector<8x128xf32>
    %163 = arith.addf %162, %18 : vector<8x128xf32>
    %164 = arith.mulf %163, %8 : vector<8x128xf32>
    %165 = math.tanh %164 : vector<8x128xf32>
    %166 = arith.mulf %165, %8 : vector<8x128xf32>
    %167 = arith.addf %166, %11 : vector<8x128xf32>
    %168 = vector.extract_strided_slice %167 {offsets = [0, 0], sizes = [8, 32], strides = [1, 1]} : vector<8x128xf32> to vector<8x32xf32>
    %169 = vector.extract_strided_slice %167 {offsets = [0, 32], sizes = [8, 32], strides = [1, 1]} : vector<8x128xf32> to vector<8x32xf32>
    %170 = vector.extract_strided_slice %167 {offsets = [0, 64], sizes = [8, 32], strides = [1, 1]} : vector<8x128xf32> to vector<8x32xf32>
    %171 = vector.extract_strided_slice %167 {offsets = [0, 96], sizes = [8, 32], strides = [1, 1]} : vector<8x128xf32> to vector<8x32xf32>
    %172 = arith.mulf %169, %141 : vector<8x32xf32>
    %173 = arith.mulf %168, %170 : vector<8x32xf32>
    %174 = arith.addf %172, %173 : vector<8x32xf32>
    %175 = math.tanh %174 : vector<8x32xf32>
    %176 = arith.mulf %171, %175 : vector<8x32xf32>
    %c40 = arith.constant 40 : index
    %c0_41 = arith.constant 0 : index
    %177 = vector.load %arg6[%c40, %c0_41] : memref<64x128xf32, #tpu.memory_space<vmem>>, vector<8x128xf32>
    %cst_42 = arith.constant dense<0.000000e+00> : vector<8x128xf32>
    %178 = tpu.matmul %159, %13, %cst_42 {dimension_numbers = #tpu.dot_dimension_numbers<[1], [0], [0], [1], [0, 0, 1, 1], [], []>} : vector<8x32xf32>, vector<32x128xf32>, vector<8x128xf32> -> vector<8x128xf32>
    %179 = arith.addf %177, %178 : vector<8x128xf32>
    %180 = arith.mulf %179, %8 : vector<8x128xf32>
    %181 = math.tanh %180 : vector<8x128xf32>
    %182 = arith.mulf %181, %8 : vector<8x128xf32>
    %183 = arith.addf %182, %11 : vector<8x128xf32>
    %184 = vector.extract_strided_slice %183 {offsets = [0, 0], sizes = [8, 32], strides = [1, 1]} : vector<8x128xf32> to vector<8x32xf32>
    %185 = vector.extract_strided_slice %183 {offsets = [0, 32], sizes = [8, 32], strides = [1, 1]} : vector<8x128xf32> to vector<8x32xf32>
    %186 = vector.extract_strided_slice %183 {offsets = [0, 64], sizes = [8, 32], strides = [1, 1]} : vector<8x128xf32> to vector<8x32xf32>
    %187 = vector.extract_strided_slice %183 {offsets = [0, 96], sizes = [8, 32], strides = [1, 1]} : vector<8x128xf32> to vector<8x32xf32>
    %188 = arith.mulf %185, %157 : vector<8x32xf32>
    %189 = arith.mulf %184, %186 : vector<8x32xf32>
    %190 = arith.addf %188, %189 : vector<8x32xf32>
    %191 = math.tanh %190 : vector<8x32xf32>
    %192 = arith.mulf %187, %191 : vector<8x32xf32>
    %cst_43 = arith.constant dense<0.000000e+00> : vector<8x128xf32>
    %193 = tpu.matmul %159, %14, %cst_43 {dimension_numbers = #tpu.dot_dimension_numbers<[1], [0], [0], [1], [0, 0, 1, 1], [], []>} : vector<8x32xf32>, vector<32x128xf32>, vector<8x128xf32> -> vector<8x128xf32>
    %cst_44 = arith.constant dense<0.000000e+00> : vector<8x128xf32>
    %194 = tpu.matmul %176, %15, %cst_44 {dimension_numbers = #tpu.dot_dimension_numbers<[1], [0], [0], [1], [0, 0, 1, 1], [], []>} : vector<8x32xf32>, vector<32x128xf32>, vector<8x128xf32> -> vector<8x128xf32>
    %195 = arith.addf %193, %194 : vector<8x128xf32>
    %196 = arith.addf %195, %18 : vector<8x128xf32>
    %197 = arith.mulf %196, %8 : vector<8x128xf32>
    %198 = math.tanh %197 : vector<8x128xf32>
    %199 = arith.mulf %198, %8 : vector<8x128xf32>
    %200 = arith.addf %199, %11 : vector<8x128xf32>
    %201 = vector.extract_strided_slice %200 {offsets = [0, 0], sizes = [8, 32], strides = [1, 1]} : vector<8x128xf32> to vector<8x32xf32>
    %202 = vector.extract_strided_slice %200 {offsets = [0, 32], sizes = [8, 32], strides = [1, 1]} : vector<8x128xf32> to vector<8x32xf32>
    %203 = vector.extract_strided_slice %200 {offsets = [0, 64], sizes = [8, 32], strides = [1, 1]} : vector<8x128xf32> to vector<8x32xf32>
    %204 = vector.extract_strided_slice %200 {offsets = [0, 96], sizes = [8, 32], strides = [1, 1]} : vector<8x128xf32> to vector<8x32xf32>
    %205 = arith.mulf %202, %174 : vector<8x32xf32>
    %206 = arith.mulf %201, %203 : vector<8x32xf32>
    %207 = arith.addf %205, %206 : vector<8x32xf32>
    %208 = math.tanh %207 : vector<8x32xf32>
    %209 = arith.mulf %204, %208 : vector<8x32xf32>
    %c0_45 = arith.constant 0 : index
    %c0_46 = arith.constant 0 : index
    %210 = vector.load %arg4[%c0_45, %c0_46] : memref<129x8xf32, #tpu.memory_space<vmem>>, vector<32x8xf32>
    %cst_47 = arith.constant dense<0.000000e+00> : vector<8x8xf32>
    %211 = tpu.matmul %209, %210, %cst_47 {dimension_numbers = #tpu.dot_dimension_numbers<[1], [0], [0], [1], [0, 0, 1, 1], [], []>} : vector<8x32xf32>, vector<32x8xf32>, vector<8x8xf32> -> vector<8x8xf32>
    %c48 = arith.constant 48 : index
    %c0_48 = arith.constant 0 : index
    %212 = vector.load %arg6[%c48, %c0_48] : memref<64x128xf32, #tpu.memory_space<vmem>>, vector<8x128xf32>
    %cst_49 = arith.constant dense<0.000000e+00> : vector<8x128xf32>
    %213 = tpu.matmul %192, %13, %cst_49 {dimension_numbers = #tpu.dot_dimension_numbers<[1], [0], [0], [1], [0, 0, 1, 1], [], []>} : vector<8x32xf32>, vector<32x128xf32>, vector<8x128xf32> -> vector<8x128xf32>
    %214 = arith.addf %212, %213 : vector<8x128xf32>
    %215 = arith.mulf %214, %8 : vector<8x128xf32>
    %216 = math.tanh %215 : vector<8x128xf32>
    %217 = arith.mulf %216, %8 : vector<8x128xf32>
    %218 = arith.addf %217, %11 : vector<8x128xf32>
    %219 = vector.extract_strided_slice %218 {offsets = [0, 0], sizes = [8, 32], strides = [1, 1]} : vector<8x128xf32> to vector<8x32xf32>
    %220 = vector.extract_strided_slice %218 {offsets = [0, 32], sizes = [8, 32], strides = [1, 1]} : vector<8x128xf32> to vector<8x32xf32>
    %221 = vector.extract_strided_slice %218 {offsets = [0, 64], sizes = [8, 32], strides = [1, 1]} : vector<8x128xf32> to vector<8x32xf32>
    %222 = vector.extract_strided_slice %218 {offsets = [0, 96], sizes = [8, 32], strides = [1, 1]} : vector<8x128xf32> to vector<8x32xf32>
    %223 = arith.mulf %220, %190 : vector<8x32xf32>
    %224 = arith.mulf %219, %221 : vector<8x32xf32>
    %225 = arith.addf %223, %224 : vector<8x32xf32>
    %226 = math.tanh %225 : vector<8x32xf32>
    %227 = arith.mulf %222, %226 : vector<8x32xf32>
    %cst_50 = arith.constant dense<0.000000e+00> : vector<8x128xf32>
    %228 = tpu.matmul %192, %14, %cst_50 {dimension_numbers = #tpu.dot_dimension_numbers<[1], [0], [0], [1], [0, 0, 1, 1], [], []>} : vector<8x32xf32>, vector<32x128xf32>, vector<8x128xf32> -> vector<8x128xf32>
    %cst_51 = arith.constant dense<0.000000e+00> : vector<8x128xf32>
    %229 = tpu.matmul %209, %15, %cst_51 {dimension_numbers = #tpu.dot_dimension_numbers<[1], [0], [0], [1], [0, 0, 1, 1], [], []>} : vector<8x32xf32>, vector<32x128xf32>, vector<8x128xf32> -> vector<8x128xf32>
    %230 = arith.addf %228, %229 : vector<8x128xf32>
    %231 = arith.addf %230, %18 : vector<8x128xf32>
    %232 = arith.mulf %231, %8 : vector<8x128xf32>
    %233 = math.tanh %232 : vector<8x128xf32>
    %234 = arith.mulf %233, %8 : vector<8x128xf32>
    %235 = arith.addf %234, %11 : vector<8x128xf32>
    %236 = vector.extract_strided_slice %235 {offsets = [0, 0], sizes = [8, 32], strides = [1, 1]} : vector<8x128xf32> to vector<8x32xf32>
    %237 = vector.extract_strided_slice %235 {offsets = [0, 32], sizes = [8, 32], strides = [1, 1]} : vector<8x128xf32> to vector<8x32xf32>
    %238 = vector.extract_strided_slice %235 {offsets = [0, 64], sizes = [8, 32], strides = [1, 1]} : vector<8x128xf32> to vector<8x32xf32>
    %239 = vector.extract_strided_slice %235 {offsets = [0, 96], sizes = [8, 32], strides = [1, 1]} : vector<8x128xf32> to vector<8x32xf32>
    %240 = arith.mulf %237, %207 : vector<8x32xf32>
    %241 = arith.mulf %236, %238 : vector<8x32xf32>
    %242 = arith.addf %240, %241 : vector<8x32xf32>
    %243 = math.tanh %242 : vector<8x32xf32>
    %244 = arith.mulf %239, %243 : vector<8x32xf32>
    %c32_52 = arith.constant 32 : index
    %c0_53 = arith.constant 0 : index
    %245 = vector.load %arg4[%c32_52, %c0_53] : memref<129x8xf32, #tpu.memory_space<vmem>>, vector<32x8xf32>
    %cst_54 = arith.constant dense<0.000000e+00> : vector<8x8xf32>
    %246 = tpu.matmul %244, %245, %cst_54 {dimension_numbers = #tpu.dot_dimension_numbers<[1], [0], [0], [1], [0, 0, 1, 1], [], []>} : vector<8x32xf32>, vector<32x8xf32>, vector<8x8xf32> -> vector<8x8xf32>
    %c56 = arith.constant 56 : index
    %c0_55 = arith.constant 0 : index
    %247 = vector.load %arg6[%c56, %c0_55] : memref<64x128xf32, #tpu.memory_space<vmem>>, vector<8x128xf32>
    %cst_56 = arith.constant dense<0.000000e+00> : vector<8x128xf32>
    %248 = tpu.matmul %227, %13, %cst_56 {dimension_numbers = #tpu.dot_dimension_numbers<[1], [0], [0], [1], [0, 0, 1, 1], [], []>} : vector<8x32xf32>, vector<32x128xf32>, vector<8x128xf32> -> vector<8x128xf32>
    %249 = arith.addf %247, %248 : vector<8x128xf32>
    %250 = arith.mulf %249, %8 : vector<8x128xf32>
    %251 = math.tanh %250 : vector<8x128xf32>
    %252 = arith.mulf %251, %8 : vector<8x128xf32>
    %253 = arith.addf %252, %11 : vector<8x128xf32>
    %254 = vector.extract_strided_slice %253 {offsets = [0, 0], sizes = [8, 32], strides = [1, 1]} : vector<8x128xf32> to vector<8x32xf32>
    %255 = vector.extract_strided_slice %253 {offsets = [0, 32], sizes = [8, 32], strides = [1, 1]} : vector<8x128xf32> to vector<8x32xf32>
    %256 = vector.extract_strided_slice %253 {offsets = [0, 64], sizes = [8, 32], strides = [1, 1]} : vector<8x128xf32> to vector<8x32xf32>
    %257 = vector.extract_strided_slice %253 {offsets = [0, 96], sizes = [8, 32], strides = [1, 1]} : vector<8x128xf32> to vector<8x32xf32>
    %258 = arith.mulf %255, %225 : vector<8x32xf32>
    %259 = arith.mulf %254, %256 : vector<8x32xf32>
    %260 = arith.addf %258, %259 : vector<8x32xf32>
    %261 = math.tanh %260 : vector<8x32xf32>
    %262 = arith.mulf %257, %261 : vector<8x32xf32>
    %cst_57 = arith.constant dense<0.000000e+00> : vector<8x128xf32>
    %263 = tpu.matmul %227, %14, %cst_57 {dimension_numbers = #tpu.dot_dimension_numbers<[1], [0], [0], [1], [0, 0, 1, 1], [], []>} : vector<8x32xf32>, vector<32x128xf32>, vector<8x128xf32> -> vector<8x128xf32>
    %cst_58 = arith.constant dense<0.000000e+00> : vector<8x128xf32>
    %264 = tpu.matmul %244, %15, %cst_58 {dimension_numbers = #tpu.dot_dimension_numbers<[1], [0], [0], [1], [0, 0, 1, 1], [], []>} : vector<8x32xf32>, vector<32x128xf32>, vector<8x128xf32> -> vector<8x128xf32>
    %265 = arith.addf %263, %264 : vector<8x128xf32>
    %266 = arith.addf %265, %18 : vector<8x128xf32>
    %267 = arith.mulf %266, %8 : vector<8x128xf32>
    %268 = math.tanh %267 : vector<8x128xf32>
    %269 = arith.mulf %268, %8 : vector<8x128xf32>
    %270 = arith.addf %269, %11 : vector<8x128xf32>
    %271 = vector.extract_strided_slice %270 {offsets = [0, 0], sizes = [8, 32], strides = [1, 1]} : vector<8x128xf32> to vector<8x32xf32>
    %272 = vector.extract_strided_slice %270 {offsets = [0, 32], sizes = [8, 32], strides = [1, 1]} : vector<8x128xf32> to vector<8x32xf32>
    %273 = vector.extract_strided_slice %270 {offsets = [0, 64], sizes = [8, 32], strides = [1, 1]} : vector<8x128xf32> to vector<8x32xf32>
    %274 = vector.extract_strided_slice %270 {offsets = [0, 96], sizes = [8, 32], strides = [1, 1]} : vector<8x128xf32> to vector<8x32xf32>
    %275 = arith.mulf %272, %242 : vector<8x32xf32>
    %276 = arith.mulf %271, %273 : vector<8x32xf32>
    %277 = arith.addf %275, %276 : vector<8x32xf32>
    %278 = math.tanh %277 : vector<8x32xf32>
    %279 = arith.mulf %274, %278 : vector<8x32xf32>
    %c64 = arith.constant 64 : index
    %c0_59 = arith.constant 0 : index
    %280 = vector.load %arg4[%c64, %c0_59] : memref<129x8xf32, #tpu.memory_space<vmem>>, vector<32x8xf32>
    %cst_60 = arith.constant dense<0.000000e+00> : vector<8x8xf32>
    %281 = tpu.matmul %279, %280, %cst_60 {dimension_numbers = #tpu.dot_dimension_numbers<[1], [0], [0], [1], [0, 0, 1, 1], [], []>} : vector<8x32xf32>, vector<32x8xf32>, vector<8x8xf32> -> vector<8x8xf32>
    %cst_61 = arith.constant dense<0.000000e+00> : vector<8x128xf32>
    %282 = tpu.matmul %262, %14, %cst_61 {dimension_numbers = #tpu.dot_dimension_numbers<[1], [0], [0], [1], [0, 0, 1, 1], [], []>} : vector<8x32xf32>, vector<32x128xf32>, vector<8x128xf32> -> vector<8x128xf32>
    %cst_62 = arith.constant dense<0.000000e+00> : vector<8x128xf32>
    %283 = tpu.matmul %279, %15, %cst_62 {dimension_numbers = #tpu.dot_dimension_numbers<[1], [0], [0], [1], [0, 0, 1, 1], [], []>} : vector<8x32xf32>, vector<32x128xf32>, vector<8x128xf32> -> vector<8x128xf32>
    %284 = arith.addf %282, %283 : vector<8x128xf32>
    %285 = arith.addf %284, %18 : vector<8x128xf32>
    %286 = arith.mulf %285, %8 : vector<8x128xf32>
    %287 = math.tanh %286 : vector<8x128xf32>
    %288 = arith.mulf %287, %8 : vector<8x128xf32>
    %289 = arith.addf %288, %11 : vector<8x128xf32>
    %290 = vector.extract_strided_slice %289 {offsets = [0, 0], sizes = [8, 32], strides = [1, 1]} : vector<8x128xf32> to vector<8x32xf32>
    %291 = vector.extract_strided_slice %289 {offsets = [0, 32], sizes = [8, 32], strides = [1, 1]} : vector<8x128xf32> to vector<8x32xf32>
    %292 = vector.extract_strided_slice %289 {offsets = [0, 64], sizes = [8, 32], strides = [1, 1]} : vector<8x128xf32> to vector<8x32xf32>
    %293 = vector.extract_strided_slice %289 {offsets = [0, 96], sizes = [8, 32], strides = [1, 1]} : vector<8x128xf32> to vector<8x32xf32>
    %294 = arith.mulf %291, %277 : vector<8x32xf32>
    %295 = arith.mulf %290, %292 : vector<8x32xf32>
    %296 = arith.addf %294, %295 : vector<8x32xf32>
    %297 = math.tanh %296 : vector<8x32xf32>
    %298 = arith.mulf %293, %297 : vector<8x32xf32>
    %c96 = arith.constant 96 : index
    %c0_63 = arith.constant 0 : index
    %299 = vector.load %arg4[%c96, %c0_63] : memref<129x8xf32, #tpu.memory_space<vmem>>, vector<32x8xf32>
    %cst_64 = arith.constant dense<0.000000e+00> : vector<8x8xf32>
    %300 = tpu.matmul %298, %299, %cst_64 {dimension_numbers = #tpu.dot_dimension_numbers<[1], [0], [0], [1], [0, 0, 1, 1], [], []>} : vector<8x32xf32>, vector<32x8xf32>, vector<8x8xf32> -> vector<8x8xf32>
    %301 = arith.addf %211, %246 : vector<8x8xf32>
    %302 = arith.addf %281, %300 : vector<8x8xf32>
    %303 = arith.addf %301, %302 : vector<8x8xf32>
    %c128 = arith.constant 128 : index
    %c0_65 = arith.constant 0 : index
    %304 = vector.load %arg4[%c128, %c0_65] : memref<129x8xf32, #tpu.memory_space<vmem>>, vector<1x8xf32>
    %305 = vector.broadcast %304 : vector<1x8xf32> to vector<8x8xf32>
    %306 = arith.addf %303, %305 : vector<8x8xf32>
    %c0_66 = arith.constant 0 : index
    %c0_67 = arith.constant 0 : index
    %307 = vector.load %arg5[%c0_66, %c0_67] : memref<8x8xf32, #tpu.memory_space<vmem>>, vector<8x8xf32>
    tpu.vector_store %arg5[%c0_66, %c0_67], %306 {strides = array<i32>} : memref<8x8xf32, #tpu.memory_space<vmem>>, vector<8x8xf32>,
    return
  }
}

</mosaic_0001>

<bundles_post_ra>
// kernel: lstm_forward.1
= control target key start
LH: loop header
LB: loop body
LE: loop exit
PB: predicated region body
PF: predicated region fallthrough
CT: control target
= control target key end

     0   :  { %v3383_v0 = vmov 0.0|0.0   ;;  %vm59_vm0 = vcmask 130048   ;;  %vm3384_vm1 = vmmov 0   ;;  %v3385_v4 = vmov 0.0   ;;  %s3387_s10 = smov 64   ;;  %s3388_s11 = smov 32   ;;  %s3958_s1 = inlined_call_operand.vmem [shape: f32[48,128], index: 1, kind: input, shape index: {}]   ;;  %s3959_s0 = inlined_call_operand.vmem [shape: f32[64,16], index: 0, kind: input, shape index: {}]   ;;  %s3960_s3 = inlined_call_operand.vmem [shape: f32[2,128], index: 3, kind: input, shape index: {}]   ;;  %s3961_s2 = inlined_call_operand.vmem [shape: f32[64,128], index: 2, kind: input, shape index: {}]   ;;  %s3962_s4 = inlined_call_operand.vmem [shape: f32[129,8], index: 4, kind: input, shape index: {}]   ;;  %s3963_s5 = inlined_call_operand.vmem [shape: f32[8,8], index: 5, kind: output, shape index: {}]  }
   0x1   :  { %3145 = vmatprep.subr.bf16.mxu1 %v3383_v0  ;;  %v27_v1 = vld [vmem:[%s3958_s1] sm:$0xff]  ;;  %v28_v2 = vld [vmem:[%s3958_s1 + $0x8] sm:$0xff]  ;;  %v29_v3 = vld [vmem:[%s3958_s1 + $0x10] sm:$0xff]  ;;  %2841 = vmatprep.mubr.msk.f32.mxu1 %vm3384_vm1, %v3385_v4  ;;  %v20_v13 = vlaneseq  ;;  %v3386_v19 = vmov 0.5   ;;  %vm198_vm5 = vcmask 261120   ;;  %vm2624_vm6 = vcmask 64512  }
   0x2   :  { %v30_v5 = vld [vmem:[%s3958_s1 + $0x18] sm:$0xff]  ;;  %v31_v6 = vld [vmem:[%s3958_s1 + $0x20] sm:$0xff]  ;;  %v32_v7 = vld [vmem:[%s3958_s1 + $0x28] sm:$0xff]  ;;  %v3141_v8 = vpack.c.bf16 %v28_v2, %v27_v1 }
   0x3   :  { %v3440_v9 = vpack.c.bf16 %v30_v5, %v29_v3  ;;  %v46_v10 = vld [vmem:[%s3959_s0] sm:$0xff]  ;;  %v3446_v11 = vpack.c.bf16 %v32_v7, %v31_v6  ;;  %v47_v12 = vld [vmem:[%s3959_s0 + $0x8] sm:$0xff]  ;;  %v21_v14 = vand.u32 127, %v20_v13  ;;  %v48_v34 = vld [vmem:[%s3959_s0 + $0x10] sm:$0xff] }
   0x4   :  { %3142 = vmatprep.subr.bf16.mxu0 %v3141_v8  ;;  %2821 = vmatprep.mubr.msk.f32.mxu0 %vm59_vm0, %v46_v10  ;;  %v3467_v15 = vld [vmem:[%s3960_s3] ss:$0 sm:$0xff]  ;;  %v49_v35 = vld [vmem:[%s3959_s0 + $0x18] sm:$0xff]  ;;  %v38_v38 = vld [vmem:[%s3961_s2 + $0x28] sm:$0xff] }
   0x5   :  { %3147 = vmatpush3.bf16.msra.mxu1 %v3440_v9  ;;  %3144 = vmatpush3.bf16.msra.mxu0 %v3141_v8  ;;  %vm22_vm2 = vcmp.ge.s32.totalorder %v21_v14, 64  ;;  %vm23_vm3 = vcmp.lt.s32.totalorder %v21_v14, 96  ;;  %v50_v36 = vld [vmem:[%s3959_s0 + $0x20] sm:$0xff]  ;;  %v39_v40 = vld [vmem:[%s3961_s2 + $0x30] sm:$0xff]  ;;  %v40_v41 = vld [vmem:[%s3961_s2 + $0x38] sm:$0xff] }
   0x6   :  { %3148 = vmatprep.subr.bf16.mxu1 %v3383_v0  ;;  %3157 = vmatprep.subr.bf16.mxu0 %v3383_v0  ;;  %vm24_vm4 = vmand %vm22_vm2, %vm23_vm3  ;;  %v37_v37 = vld [vmem:[%s3961_s2 + $0x20] sm:$0xff]  ;;  %v51_v42 = vld [vmem:[%s3959_s0 + $0x28] sm:$0xff]  ;;  %v3514_v43 = vpack.c.bf16 %v40_v41, %v39_v40 }
   0x7   :  { %v3472_v20 = vsel %vm24_vm4, 1.0, %v3386_v19  ;;  %v3475_v26 = vsel %vm24_vm4, 0.0, %v3386_v19  ;;  %v3500_v39 = vpack.c.bf16 %v38_v38, %v37_v37  ;;  %v52_v45 = vld [vmem:[%s3959_s0 + $0x30] sm:$0xff]  ;;  %v53_v46 = vld [vmem:[%s3959_s0 + $0x38] sm:$0xff]  ;;  %v33_v53 = vld [vmem:[%s3961_s2] sm:$0xff] }
   0x8   :  { %2822 = vmatmul.mubr.msk.f32.vlgmr.msra.gmra.mrb[0].mxu0 %vm59_vm0, %v47_v12  ;;  %v34_v54 = vld [vmem:[%s3961_s2 + $0x8] sm:$0xff]  ;;  %v35_v56 = vld [vmem:[%s3961_s2 + $0x10] sm:$0xff]  ;;  %v36_v57 = vld [vmem:[%s3961_s2 + $0x18] sm:$0xff] }
   0x9   :  { %3150 = vmatpush3.bf16.msra.mxu1 %v3446_v11  ;;  %2824 = vmatprep.mubr.msk.f32.mxu0 %vm59_vm0, %v48_v34  ;;  %v3553_v55 = vpack.c.bf16 %v34_v54, %v33_v53  ;;  %v3563_v59 = vpack.c.bf16 %v36_v57, %v35_v56  ;;  %v3587_v7 = vld [vmem:[%s3960_s3 + $0x1] ss:$0 sm:$0xff] }
   0xa   :  { %3151 = vmatprep.subr.bf16.mxu1 %v3383_v0  ;;  %3159 = vmatpush3.bf16.msra.mxu0 %v3500_v39 }
   0xb   :  { %3160 = vmatprep.subr.bf16.mxu0 %v3383_v0 }
   0xc   :  { %2842 = vmatmul.mubr.f32.vlgmr.msra.gmra.mrb[0].mxu1 %v3385_v4  ;;  %2825 = vmatmul.mubr.msk.f32.gmra.mrb[2].mxu0 %vm59_vm0, %v49_v35 }
   0xd   :  { %3153 = vmatpush3.bf16.msra.mxu1 %v3440_v9  ;;  %2852 = vmatprep.mubr.msk.f32.mxu1 %vm3384_vm1, %v3385_v4 }
   0xe   :  { %3154 = vmatprep.subr.bf16.mxu1 %v3383_v0  ;;  %2827 = vmatprep.mubr.msk.f32.mxu0 %vm59_vm0, %v50_v36 }
   0xf   :  { %3162 = vmatpush3.bf16.msra.mxu0 %v3514_v43 }
  0x10   :  { %2828 = vmatmul.mubr.msk.f32.gmra.mrb[4].mxu0 %vm59_vm0, %v51_v42  ;;  %3169 = vmatprep.subr.bf16.mxu0 %v3383_v0 }
  0x11   :  { %3156 = vmatpush3.bf16.msra.mxu1 %v3446_v11  ;;  %2830 = vmatprep.mubr.msk.f32.mxu0 %vm59_vm0, %v52_v45 }
  0x12   :  { %3163 = vmatprep.subr.bf16.mxu1 %v3383_v0 }
  0x14   :  { %2831 = vmatmul.mubr.msk.f32.gmra.mrb[6].mxu0 %vm59_vm0, %v53_v46 }
  0x15   :  { %2863 = vmatprep.mubr.msk.f32.mxu0 %vm3384_vm1, %v3385_v4 }
  0x18   :  { %2864 = vmatmul.mubr.f32.vlgmr.msra.gmra.mrb[8].mxu0 %v3385_v4 }
  0x19   :  { %3171 = vmatpush3.bf16.msra.mxu0 %v3440_v9  ;;  %2885 = vmatprep.mubr.msk.f32.mxu0 %vm3384_vm1, %v3385_v4 }
  0x1a   :  { %3172 = vmatprep.subr.bf16.mxu0 %v3383_v0 }
  0x1d   :  { %3174 = vmatpush3.bf16.msra.mxu0 %v3446_v11 }
  0x1e   :  { %3181 = vmatprep.subr.bf16.mxu0 %v3383_v0 }
  0xdb   :  { %v3469_v16 = vpop.f32.mrb[0].mxu0 }
  0xdc   :  { %v150_v17 = vpop.f32.mrb[1].mxu0  ;;  %v156_v1 = vadd.f32 %v3469_v16, %v3467_v15 }
  0xdd   :  { %v151_v18 = vadd.f32 %v3467_v15, %v150_v17 }
  0xdf   :  { %v268_v21 = vpop.f32.mrb[0].mxu1  ;;  %v3539_v49 = vpop.f32.mrb[2].mxu0 }
  0xe0   :  { %v272_v22 = vadd.f32 %v268_v21, %v151_v18  ;;  %v2843_v23 = vpop.f32.mrb[1].mxu1  ;;  %v3541_v50 = vpop.f32.mrb[3].mxu0 }
  0xe2   :  { %v273_v24 = vmul.f32 %v272_v22, %v3472_v20 }
  0xe3   :  { %v3543_v51 = vpop.f32.mrb[4].mxu0 }
  0xe4   :  { %3319 = vtanh.f32 %v273_v24  ;;  %v3545_v52 = vpop.f32.mrb[5].mxu0 }
  0xe7   :  { %v3577_v60 = vpop.f32.mrb[6].mxu0 }
  0xe8   :  { %v3579_v61 = vpop.f32.mrb[7].mxu0 }
  0xeb   :  { %v458_v62 = vpop.f32.mrb[8].mxu0 }
  0xec   :  { %v2865_v63 = vpop.f32.mrb[9].mxu0 }
  0xee   :  { %v3320_v25 = vpop.eup %3319 }
  0xef   :  { %v275_v27 = vmul.f32 %v3320_v25, %v3472_v20 }
  0xf1   :  { %v276_v28 = vadd.f32 %v275_v27, %v3475_v26 }
  0xf3   :  { %279 = vrot.lane.b32.xlu0 %v276_v28, %s3387_s10  ;;  %v277_v31 = vmul.f32 0.0, %v276_v28 }
 0x165   :  { %v280_v29 = vpop.permute.xlu0 %279 }
 0x166   :  { %v282_v30 = vmul.f32 %v280_v29, %v276_v28 }
 0x168   :  { %284 = vrot.lane.b32.xlu0 %v282_v30, %s3388_s11 }
 0x1da   :  { %v285_v32 = vpop.permute.xlu0 %284 }
 0x1db   :  { %v3481_v33 = vadd.f32 %v285_v32, %v277_v31 }
 0x1dd   :  { %3321 = vtanh.f32 %v3481_v33 }
 0x1e7   :  { %v3322_v44 = vpop.eup %3321 }
 0x1e8   :  { %290 = vrot.lane.b32.xlu1 %v3322_v44, %s3387_s10  ;;  %v161_v44 = vadd.f32 %v3467_v15, %v3541_v50 }
 0x25a   :  { %v291_v47 = vpop.permute.xlu1 %290 }
 0x25b   :  { %v293_v48 = vmul.f32 %v291_v47, %v276_v28 }
 0x25d   :  { %296 = vrot.lane.b32.xlu1 %v293_v48, %s3388_s11 }
 0x2cf   :  { %v297_v58 = vpop.permute.xlu1 %296 }
 0x2d0   :  { %2853 = vmatmul.mubr.msk.f32.vlgmr.msra.gmra.mrb[2].mxu1 %vm198_vm5, %v297_v58 }
 0x2d1   :  { %3165 = vmatpush3.bf16.msra.mxu1 %v3553_v55  ;;  %2874 = vmatprep.mubr.msk.f32.mxu1 %vm3384_vm1, %v3385_v4 }
 0x2d2   :  { %3166 = vmatprep.subr.bf16.mxu1 %v3383_v0 }
 0x2d5   :  { %3168 = vmatpush3.bf16.msra.mxu1 %v3563_v59 }
 0x2d6   :  { %3175 = vmatprep.subr.bf16.mxu1 %v3383_v0 }
 0x2d8   :  { %2875 = vmatmul.mubr.msk.f32.vlgmr.msra.gmra.mrb[4].mxu1 %vm198_vm5, %v297_v58 }
 0x2d9   :  { %3177 = vmatpush3.bf16.msra.mxu1 %v3500_v39  ;;  %2896 = vmatprep.mubr.msk.f32.mxu1 %vm3384_vm1, %v3385_v4 }
 0x2da   :  { %3178 = vmatprep.subr.bf16.mxu1 %v3383_v0 }
 0x2dd   :  { %3180 = vmatpush3.bf16.msra.mxu1 %v3514_v43 }
 0x2de   :  { %3187 = vmatprep.subr.bf16.mxu1 %v3383_v0 }
 0x3a3   :  { %v366_v2 = vpop.f32.mrb[2].mxu1 }
 0x3a4   :  { %v370_v3 = vadd.f32 %v366_v2, %v156_v1  ;;  %v2854_v5 = vpop.f32.mrb[3].mxu1 }
 0x3a6   :  { %v371_v6 = vmul.f32 %v370_v3, %v3472_v20 }
 0x3a8   :  { %3323 = vtanh.f32 %v371_v6 }
 0x3ab   :  { %v528_v8 = vpop.f32.mrb[4].mxu1 }
 0x3ac   :  { %v529_v10 = vadd.f32 %v528_v8, %v458_v62  ;;  %v2876_v12 = vpop.f32.mrb[5].mxu1 }
 0x3ae   :  { %v532_v13 = vadd.f32 %v3587_v7, %v529_v10 }
 0x3b0   :  { %v533_v14 = vmul.f32 %v532_v13, %v3472_v20 }
 0x3b2   :  { %v3324_v17 = vpop.eup %3323  ;;  %3325 = vtanh.f32 %v533_v14 }
 0x3b3   :  { %v373_v16 = vmul.f32 %v3324_v17, %v3472_v20 }
 0x3b5   :  { %v374_v18 = vadd.f32 %v373_v16, %v3475_v26 }
 0x3b7   :  { %377 = vrot.lane.b32.xlu0 %v374_v18, %s3387_s10  ;;  %v375_v28 = vmul.f32 %v374_v18, %v3481_v33 }
 0x3bc   :  { %v3326_v19 = vpop.eup %3325 }
 0x3bd   :  { %v535_v21 = vmul.f32 %v3326_v19, %v3472_v20 }
 0x3bf   :  { %v536_v22 = vadd.f32 %v535_v21, %v3475_v26 }
 0x3c1   :  { %539 = vrot.lane.b32.xlu1 %v536_v22, %s3387_s10  ;;  %v537_v31 = vmul.f32 0.0, %v536_v22 }
 0x429   :  { %v378_v23 = vpop.permute.xlu0 %377 }
 0x42a   :  { %v380_v24 = vmul.f32 %v378_v23, %v374_v18 }
 0x42c   :  { %382 = vrot.lane.b32.xlu0 %v380_v24, %s3388_s11 }
 0x433   :  { %v540_v25 = vpop.permute.xlu1 %539 }
 0x434   :  { %v542_v27 = vmul.f32 %v540_v25, %v536_v22 }
 0x436   :  { %544 = vrot.lane.b32.xlu1 %v542_v27, %s3388_s11 }
 0x49e   :  { %v383_v29 = vpop.permute.xlu0 %382 }
 0x49f   :  { %v3600_v30 = vadd.f32 %v383_v29, %v375_v28 }
 0x4a1   :  { %3327 = vtanh.f32 %v3600_v30 }
 0x4a8   :  { %v545_v32 = vpop.permute.xlu1 %544 }
 0x4a9   :  { %v3603_v34 = vadd.f32 %v545_v32, %v537_v31  ;;  %v166_v31 = vadd.f32 %v3539_v49, %v3467_v15 }
 0x4ab   :  { %v3328_v35 = vpop.eup %3327  ;;  %3329 = vtanh.f32 %v3603_v34 }
 0x4ac   :  { %388 = vrot.lane.b32.xlu0 %v3328_v35, %s3387_s10 }
 0x4b5   :  { %v3330_v36 = vpop.eup %3329 }
 0x4b6   :  { %550 = vrot.lane.b32.xlu1 %v3330_v36, %s3387_s10 }
 0x51e   :  { %v389_v37 = vpop.permute.xlu0 %388 }
 0x51f   :  { %v391_v38 = vmul.f32 %v389_v37, %v374_v18 }
 0x521   :  { %556 = vrot.lane.b32.xlu0 %v391_v38, %s3388_s11 }
 0x528   :  { %v551_v33 = vpop.permute.xlu1 %550 }
 0x529   :  { %v553_v40 = vmul.f32 %v551_v33, %v536_v22 }
 0x52b   :  { %653 = vrot.lane.b32.xlu1 %v553_v40, %s3388_s11 }
 0x593   :  { %v557_v41 = vpop.permute.xlu0 %556 }
 0x594   :  { %2886 = vmatmul.mubr.msk.f32.vlgmr.msra.gmra.mrb[10].mxu0 %vm198_vm5, %v557_v41 }
 0x595   :  { %3183 = vmatpush3.bf16.msra.mxu0 %v3553_v55  ;;  %2907 = vmatprep.mubr.msk.f32.mxu0 %vm3384_vm1, %v3385_v4 }
 0x596   :  { %3184 = vmatprep.subr.bf16.mxu0 %v3383_v0 }
 0x599   :  { %3186 = vmatpush3.bf16.msra.mxu0 %v3563_v59 }
 0x59a   :  { %3193 = vmatprep.subr.bf16.mxu0 %v3383_v0 }
 0x59c   :  { %2908 = vmatmul.mubr.msk.f32.vlgmr.msra.gmra.mrb[12].mxu0 %vm198_vm5, %v557_v41 }
 0x59d   :  { %v654_v42 = vpop.permute.xlu1 %653  ;;  %3195 = vmatpush3.bf16.msra.mxu0 %v3500_v39  ;;  %2929 = vmatprep.mubr.msk.f32.mxu0 %vm3384_vm1, %v3385_v4 }
 0x59e   :  { %2897 = vmatmul.mubr.msk.f32.vlgmr.msra.gmra.mrb[6].mxu1 %vm198_vm5, %v654_v42  ;;  %3196 = vmatprep.subr.bf16.mxu0 %v3383_v0 }
 0x59f   :  { %3189 = vmatpush3.bf16.msra.mxu1 %v3440_v9  ;;  %2918 = vmatprep.mubr.msk.f32.mxu1 %vm3384_vm1, %v3385_v4 }
 0x5a0   :  { %3190 = vmatprep.subr.bf16.mxu1 %v3383_v0 }
 0x5a1   :  { %3198 = vmatpush3.bf16.msra.mxu0 %v3514_v43 }
 0x5a2   :  { %3205 = vmatprep.subr.bf16.mxu0 %v3383_v0 }
 0x5a3   :  { %3192 = vmatpush3.bf16.msra.mxu1 %v3446_v11 }
 0x5a4   :  { %3199 = vmatprep.subr.bf16.mxu1 %v3383_v0 }
 0x667   :  { %v626_v45 = vpop.f32.mrb[10].mxu0 }
 0x668   :  { %v630_v46 = vadd.f32 %v626_v45, %v161_v44  ;;  %v2887_v47 = vpop.f32.mrb[11].mxu0 }
 0x66a   :  { %v631_v48 = vmul.f32 %v630_v46, %v3472_v20 }
 0x66c   :  { %3331 = vtanh.f32 %v631_v48 }
 0x66f   :  { %v793_v53 = vpop.f32.mrb[12].mxu0 }
 0x670   :  { %v2909_v54 = vpop.f32.mrb[13].mxu0 }
 0x671   :  { %v723_v56 = vpop.f32.mrb[6].mxu1 }
 0x672   :  { %v794_v57 = vadd.f32 %v793_v53, %v723_v56  ;;  %v2898_v58 = vpop.f32.mrb[7].mxu1 }
 0x674   :  { %v797_v62 = vadd.f32 %v3587_v7, %v794_v57 }
 0x676   :  { %v3332_v63 = vpop.eup %3331  ;;  %v798_v1 = vmul.f32 %v797_v62, %v3472_v20 }
 0x677   :  { %v633_v2 = vmul.f32 %v3332_v63, %v3472_v20 }
 0x678   :  { %3333 = vtanh.f32 %v798_v1 }
 0x679   :  { %v634_v50 = vadd.f32 %v633_v2, %v3475_v26 }
 0x67b   :  { %637 = vrot.lane.b32.xlu0 %v634_v50, %s3387_s10  ;;  %v635_v14 = vmul.f32 %v634_v50, %v3600_v30 }
 0x682   :  { %v3334_v3 = vpop.eup %3333 }
 0x683   :  { %v800_v5 = vmul.f32 %v3334_v3, %v3472_v20 }
 0x685   :  { %v801_v6 = vadd.f32 %v800_v5, %v3475_v26 }
 0x687   :  { %804 = vrot.lane.b32.xlu1 %v801_v6, %s3387_s10  ;;  %v802_v18 = vmul.f32 %v801_v6, %v3603_v34 }
 0x6ed   :  { %v638_v8 = vpop.permute.xlu0 %637 }
 0x6ee   :  { %v640_v10 = vmul.f32 %v638_v8, %v634_v50 }
 0x6f0   :  { %642 = vrot.lane.b32.xlu0 %v640_v10, %s3388_s11 }
 0x6f9   :  { %v805_v12 = vpop.permute.xlu1 %804 }
 0x6fa   :  { %v807_v13 = vmul.f32 %v805_v12, %v801_v6 }
 0x6fc   :  { %809 = vrot.lane.b32.xlu1 %v807_v13, %s3388_s11 }
 0x762   :  { %v643_v17 = vpop.permute.xlu0 %642 }
 0x763   :  { %v3645_v16 = vadd.f32 %v643_v17, %v635_v14 }
 0x765   :  { %3335 = vtanh.f32 %v3645_v16 }
 0x76e   :  { %v810_v19 = vpop.permute.xlu1 %809 }
 0x76f   :  { %v3336_v21 = vpop.eup %3335  ;;  %v3649_v22 = vadd.f32 %v810_v19, %v802_v18 }
 0x770   :  { %648 = vrot.lane.b32.xlu0 %v3336_v21, %s3387_s10 }
 0x771   :  { %3337 = vtanh.f32 %v3649_v22 }
 0x77b   :  { %v3338_v23 = vpop.eup %3337 }
 0x77c   :  { %815 = vrot.lane.b32.xlu1 %v3338_v23, %s3387_s10 }
 0x7e2   :  { %v649_v24 = vpop.permute.xlu0 %648 }
 0x7e3   :  { %v651_v25 = vmul.f32 %v649_v24, %v634_v50 }
 0x7e5   :  { %821 = vrot.lane.b32.xlu0 %v651_v25, %s3388_s11 }
 0x7ee   :  { %v816_v27 = vpop.permute.xlu1 %815 }
 0x7ef   :  { %v818_v28 = vmul.f32 %v816_v27, %v801_v6 }
 0x7f1   :  { %918 = vrot.lane.b32.xlu1 %v818_v28, %s3388_s11 }
 0x857   :  { %v822_v29 = vpop.permute.xlu0 %821 }
 0x858   :  { %2919 = vmatmul.mubr.msk.f32.vlgmr.msra.gmra.mrb[8].mxu1 %vm198_vm5, %v822_v29 }
 0x859   :  { %3201 = vmatpush3.bf16.msra.mxu1 %v3553_v55  ;;  %2940 = vmatprep.mubr.msk.f32.mxu1 %vm3384_vm1, %v3385_v4 }
 0x85a   :  { %3202 = vmatprep.subr.bf16.mxu1 %v3383_v0 }
 0x85d   :  { %3204 = vmatpush3.bf16.msra.mxu1 %v3563_v59 }
 0x85e   :  { %3211 = vmatprep.subr.bf16.mxu1 %v3383_v0 }
 0x860   :  { %2941 = vmatmul.mubr.msk.f32.vlgmr.msra.gmra.mrb[10].mxu1 %vm198_vm5, %v822_v29 }
 0x861   :  { %3213 = vmatpush3.bf16.msra.mxu1 %v3500_v39  ;;  %2962 = vmatprep.mubr.msk.f32.mxu1 %vm3384_vm1, %v3385_v4 }
 0x862   :  { %3214 = vmatprep.subr.bf16.mxu1 %v3383_v0 }
 0x863   :  { %v919_v30 = vpop.permute.xlu1 %918 }
 0x864   :  { %2930 = vmatmul.mubr.msk.f32.vlgmr.msra.gmra.mrb[14].mxu0 %vm198_vm5, %v919_v30 }
 0x865   :  { %3207 = vmatpush3.bf16.msra.mxu0 %v3440_v9  ;;  %2951 = vmatprep.mubr.msk.f32.mxu0 %vm3384_vm1, %v3385_v4 }
 0x866   :  { %3208 = vmatprep.subr.bf16.mxu0 %v3383_v0  ;;  %3216 = vmatpush3.bf16.msra.mxu1 %v3514_v43 }
 0x867   :  { %3223 = vmatprep.subr.bf16.mxu1 %v3383_v0 }
 0x869   :  { %3210 = vmatpush3.bf16.msra.mxu0 %v3446_v11 }
 0x86a   :  { %3217 = vmatprep.subr.bf16.mxu0 %v3383_v0 }
 0x92b   :  { %v891_v32 = vpop.f32.mrb[8].mxu1 }
 0x92c   :  { %v895_v34 = vadd.f32 %v891_v32, %v166_v31  ;;  %v2920_v35 = vpop.f32.mrb[9].mxu1 }
 0x92e   :  { %v896_v36 = vmul.f32 %v895_v34, %v3472_v20 }
 0x930   :  { %3339 = vtanh.f32 %v896_v36 }
 0x933   :  { %v1058_v37 = vpop.f32.mrb[10].mxu1 }
 0x934   :  { %v2942_v38 = vpop.f32.mrb[11].mxu1 }
 0x937   :  { %v988_v33 = vpop.f32.mrb[14].mxu0 }
 0x938   :  { %v1059_v40 = vadd.f32 %v1058_v37, %v988_v33  ;;  %v2931_v41 = vpop.f32.mrb[15].mxu0 }
 0x93a   :  { %v3340_v42 = vpop.eup %3339  ;;  %v1062_v44 = vadd.f32 %v3587_v7, %v1059_v40 }
 0x93b   :  { %v898_v45 = vmul.f32 %v3340_v42, %v3472_v20 }
 0x93c   :  { %v1063_v46 = vmul.f32 %v1062_v44, %v3472_v20 }
 0x93d   :  { %v899_v49 = vadd.f32 %v898_v45, %v3475_v26 }
 0x93e   :  { %3341 = vtanh.f32 %v1063_v46 }
 0x93f   :  { %902 = vrot.lane.b32.xlu0 %v899_v49, %s3387_s10  ;;  %v900_v62 = vmul.f32 %v899_v49, %v3645_v16  ;;  %v171_v16 = vadd.f32 %v3467_v15, %v3545_v52 }
 0x948   :  { %v3342_v47 = vpop.eup %3341 }
 0x949   :  { %v1065_v48 = vmul.f32 %v3342_v47, %v3472_v20 }
 0x94b   :  { %v1066_v53 = vadd.f32 %v1065_v48, %v3475_v26 }
 0x94d   :  { %1069 = vrot.lane.b32.xlu1 %v1066_v53, %s3387_s10  ;;  %v1067_v50 = vmul.f32 %v1066_v53, %v3649_v22 }
 0x9b1   :  { %v903_v54 = vpop.permute.xlu0 %902 }
 0x9b2   :  { %v905_v56 = vmul.f32 %v903_v54, %v899_v49 }
 0x9b4   :  { %907 = vrot.lane.b32.xlu0 %v905_v56, %s3388_s11 }
 0x9bf   :  { %v1070_v57 = vpop.permute.xlu1 %1069 }
 0x9c0   :  { %v1072_v58 = vmul.f32 %v1070_v57, %v1066_v53 }
 0x9c2   :  { %1074 = vrot.lane.b32.xlu1 %v1072_v58, %s3388_s11 }
 0xa26   :  { %v908_v63 = vpop.permute.xlu0 %907 }
 0xa27   :  { %v3691_v1 = vadd.f32 %v908_v63, %v900_v62  ;;  %v176_v63 = vadd.f32 %v3543_v51, %v3467_v15 }
 0xa29   :  { %3343 = vtanh.f32 %v3691_v1 }
 0xa33   :  { %v3344_v2 = vpop.eup %3343 }
 0xa34   :  { %v1075_v3 = vpop.permute.xlu1 %1074  ;;  %913 = vrot.lane.b32.xlu0 %v3344_v2, %s3387_s10 }
 0xa35   :  { %v3696_v5 = vadd.f32 %v1075_v3, %v1067_v50 }
 0xa37   :  { %3345 = vtanh.f32 %v3696_v5 }
 0xa41   :  { %v3346_v6 = vpop.eup %3345 }
 0xa42   :  { %1080 = vrot.lane.b32.xlu1 %v3346_v6, %s3387_s10 }
 0xaa6   :  { %v914_v8 = vpop.permute.xlu0 %913 }
 0xaa7   :  { %v916_v10 = vmul.f32 %v914_v8, %v899_v49 }
 0xaa9   :  { %1086 = vrot.lane.b32.xlu0 %v916_v10, %s3388_s11 }
 0xab4   :  { %v1081_v12 = vpop.permute.xlu1 %1080 }
 0xab5   :  { %v1083_v13 = vmul.f32 %v1081_v12, %v1066_v53 }
 0xab7   :  { %1183 = vrot.lane.b32.xlu1 %v1083_v13, %s3388_s11 }
 0xb1b   :  { %v1087_v14 = vpop.permute.xlu0 %1086 }
 0xb1c   :  { %2952 = vmatmul.mubr.msk.f32.vlgmr.msra.gmra.mrb[16].mxu0 %vm198_vm5, %v1087_v14 }
 0xb1d   :  { %3219 = vmatpush3.bf16.msra.mxu0 %v3553_v55  ;;  %2973 = vmatprep.mubr.msk.f32.mxu0 %vm3384_vm1, %v3385_v4 }
 0xb1e   :  { %3220 = vmatprep.subr.bf16.mxu0 %v3383_v0 }
 0xb21   :  { %3222 = vmatpush3.bf16.msra.mxu0 %v3563_v59 }
 0xb22   :  { %3229 = vmatprep.subr.bf16.mxu0 %v3383_v0 }
 0xb24   :  { %2974 = vmatmul.mubr.msk.f32.vlgmr.msra.gmra.mrb[18].mxu0 %vm198_vm5, %v1087_v14 }
 0xb25   :  { %3231 = vmatpush3.bf16.msra.mxu0 %v3500_v39  ;;  %2995 = vmatprep.mubr.msk.f32.mxu0 %vm3384_vm1, %v3385_v4 }
 0xb26   :  { %3232 = vmatprep.subr.bf16.mxu0 %v3383_v0 }
 0xb29   :  { %v1184_v17 = vpop.permute.xlu1 %1183  ;;  %3234 = vmatpush3.bf16.msra.mxu0 %v3514_v43 }
 0xb2a   :  { %2963 = vmatmul.mubr.msk.f32.vlgmr.msra.gmra.mrb[12].mxu1 %vm198_vm5, %v1184_v17  ;;  %3241 = vmatprep.subr.bf16.mxu0 %v3383_v0 }
 0xb2b   :  { %3225 = vmatpush3.bf16.msra.mxu1 %v3440_v9  ;;  %2984 = vmatprep.mubr.msk.f32.mxu1 %vm3384_vm1, %v3385_v4 }
 0xb2c   :  { %3226 = vmatprep.subr.bf16.mxu1 %v3383_v0 }
 0xb2f   :  { %3228 = vmatpush3.bf16.msra.mxu1 %v3446_v11 }
 0xb30   :  { %3235 = vmatprep.subr.bf16.mxu1 %v3383_v0 }
 0xbef   :  { %v1156_v18 = vpop.f32.mrb[16].mxu0 }
 0xbf0   :  { %v1160_v19 = vadd.f32 %v1156_v18, %v171_v16  ;;  %v2953_v21 = vpop.f32.mrb[17].mxu0 }
 0xbf2   :  { %v1161_v22 = vmul.f32 %v1160_v19, %v3472_v20 }
 0xbf4   :  { %3347 = vtanh.f32 %v1161_v22 }
 0xbf7   :  { %v1323_v23 = vpop.f32.mrb[18].mxu0 }
 0xbf8   :  { %v2975_v24 = vpop.f32.mrb[19].mxu0 }
 0xbfd   :  { %v1253_v25 = vpop.f32.mrb[12].mxu1 }
 0xbfe   :  { %v3348_v27 = vpop.eup %3347  ;;  %v1324_v28 = vadd.f32 %v1323_v23, %v1253_v25  ;;  %v2964_v29 = vpop.f32.mrb[13].mxu1 }
 0xbff   :  { %v1163_v30 = vmul.f32 %v3348_v27, %v3472_v20 }
 0xc00   :  { %v1327_v31 = vadd.f32 %v3587_v7, %v1324_v28 }
 0xc01   :  { %v1164_v32 = vadd.f32 %v1163_v30, %v3475_v26 }
 0xc02   :  { %v1328_v52 = vmul.f32 %v1327_v31, %v3472_v20 }
 0xc03   :  { %1167 = vrot.lane.b32.xlu0 %v1164_v32, %s3387_s10  ;;  %v1165_v41 = vmul.f32 %v1164_v32, %v3691_v1 }
 0xc04   :  { %3349 = vtanh.f32 %v1328_v52 }
 0xc0e   :  { %v3350_v34 = vpop.eup %3349 }
 0xc0f   :  { %v1330_v35 = vmul.f32 %v3350_v34, %v3472_v20 }
 0xc11   :  { %v1331_v36 = vadd.f32 %v1330_v35, %v3475_v26 }
 0xc13   :  { %1334 = vrot.lane.b32.xlu1 %v1331_v36, %s3387_s10  ;;  %v1332_v46 = vmul.f32 %v1331_v36, %v3696_v5 }
 0xc75   :  { %v1168_v37 = vpop.permute.xlu0 %1167 }
 0xc76   :  { %v1170_v38 = vmul.f32 %v1168_v37, %v1164_v32 }
 0xc78   :  { %1172 = vrot.lane.b32.xlu0 %v1170_v38, %s3388_s11 }
 0xc85   :  { %v1335_v33 = vpop.permute.xlu1 %1334 }
 0xc86   :  { %v1337_v40 = vmul.f32 %v1335_v33, %v1331_v36 }
 0xc88   :  { %1339 = vrot.lane.b32.xlu1 %v1337_v40, %s3388_s11 }
 0xcea   :  { %v1173_v42 = vpop.permute.xlu0 %1172 }
 0xceb   :  { %v3737_v44 = vadd.f32 %v1173_v42, %v1165_v41 }
 0xced   :  { %3351 = vtanh.f32 %v3737_v44 }
 0xcf7   :  { %v3352_v45 = vpop.eup %3351 }
 0xcf8   :  { %1178 = vrot.lane.b32.xlu0 %v3352_v45, %s3387_s10 }
 0xcfa   :  { %v1340_v49 = vpop.permute.xlu1 %1339 }
 0xcfb   :  { %v3742_v47 = vadd.f32 %v1340_v49, %v1332_v46 }
 0xcfd   :  { %3353 = vtanh.f32 %v3742_v47 }
 0xd07   :  { %v3354_v48 = vpop.eup %3353 }
 0xd08   :  { %1345 = vrot.lane.b32.xlu1 %v3354_v48, %s3387_s10 }
 0xd6a   :  { %v1179_v53 = vpop.permute.xlu0 %1178 }
 0xd6b   :  { %v1181_v54 = vmul.f32 %v1179_v53, %v1164_v32 }
 0xd6d   :  { %1351 = vrot.lane.b32.xlu0 %v1181_v54, %s3388_s11 }
 0xd7a   :  { %v1346_v56 = vpop.permute.xlu1 %1345 }
 0xd7b   :  { %v1348_v57 = vmul.f32 %v1346_v56, %v1331_v36 }
 0xd7d   :  { %1448 = vrot.lane.b32.xlu1 %v1348_v57, %s3388_s11 }
 0xddf   :  { %v1352_v58 = vpop.permute.xlu0 %1351 }
 0xde0   :  { %2985 = vmatmul.mubr.msk.f32.vlgmr.msra.gmra.mrb[14].mxu1 %vm198_vm5, %v1352_v58 }
 0xde1   :  { %3237 = vmatpush3.bf16.msra.mxu1 %v3553_v55  ;;  %3006 = vmatprep.mubr.msk.f32.mxu1 %vm3384_vm1, %v3385_v4 }
 0xde2   :  { %3238 = vmatprep.subr.bf16.mxu1 %v3383_v0 }
 0xde5   :  { %3240 = vmatpush3.bf16.msra.mxu1 %v3563_v59 }
 0xde6   :  { %3247 = vmatprep.subr.bf16.mxu1 %v3383_v0 }
 0xde8   :  { %3007 = vmatmul.mubr.msk.f32.vlgmr.msra.gmra.mrb[16].mxu1 %vm198_vm5, %v1352_v58 }
 0xde9   :  { %3249 = vmatpush3.bf16.msra.mxu1 %v3500_v39  ;;  %3028 = vmatprep.mubr.msk.f32.mxu1 %vm3384_vm1, %v3385_v4 }
 0xdea   :  { %3250 = vmatprep.subr.bf16.mxu1 %v3383_v0 }
 0xded   :  { %3252 = vmatpush3.bf16.msra.mxu1 %v3514_v43 }
 0xdee   :  { %3259 = vmatprep.subr.bf16.mxu1 %v3383_v0 }
 0xdef   :  { %v1449_v62 = vpop.permute.xlu1 %1448 }
 0xdf0   :  { %2996 = vmatmul.mubr.msk.f32.vlgmr.msra.gmra.mrb[20].mxu0 %vm198_vm5, %v1449_v62 }
 0xdf1   :  { %3243 = vmatpush3.bf16.msra.mxu0 %v3440_v9  ;;  %3017 = vmatprep.mubr.msk.f32.mxu0 %vm3384_vm1, %v3385_v4 }
 0xdf2   :  { %3244 = vmatprep.subr.bf16.mxu0 %v3383_v0 }
 0xdf5   :  { %3246 = vmatpush3.bf16.msra.mxu0 %v3446_v11 }
 0xdf6   :  { %3253 = vmatprep.subr.bf16.mxu0 %v3383_v0 }
 0xeb3   :  { %v1421_v1 = vpop.f32.mrb[14].mxu1 }
 0xeb4   :  { %v1425_v2 = vadd.f32 %v1421_v1, %v176_v63  ;;  %v2986_v50 = vpop.f32.mrb[15].mxu1 }
 0xeb6   :  { %v1426_v3 = vmul.f32 %v1425_v2, %v3472_v20 }
 0xeb8   :  { %3355 = vtanh.f32 %v1426_v3 }
 0xebb   :  { %v1588_v5 = vpop.f32.mrb[16].mxu1 }
 0xebc   :  { %v3008_v6 = vpop.f32.mrb[17].mxu1 }
 0xec2   :  { %v3356_v8 = vpop.eup %3355 }
 0xec3   :  { %v1518_v10 = vpop.f32.mrb[20].mxu0  ;;  %v1428_v12 = vmul.f32 %v3356_v8, %v3472_v20 }
 0xec4   :  { %v1589_v13 = vadd.f32 %v1588_v5, %v1518_v10  ;;  %v2997_v14 = vpop.f32.mrb[21].mxu0 }
 0xec5   :  { %v1429_v17 = vadd.f32 %v1428_v12, %v3475_v26 }
 0xec6   :  { %v1592_v16 = vadd.f32 %v3587_v7, %v1589_v13 }
 0xec7   :  { %1432 = vrot.lane.b32.xlu0 %v1429_v17, %s3387_s10  ;;  %v1430_v27 = vmul.f32 %v1429_v17, %v3737_v44 }
 0xec8   :  { %v1593_v51 = vmul.f32 %v1592_v16, %v3472_v20  ;;  %v1883_v16 = vld [vmem:[%s3962_s4 + $0x20] sm:$0xff] }
 0xeca   :  { %3357 = vtanh.f32 %v1593_v51  ;;  %v1884_v51 = vld [vmem:[%s3962_s4 + $0x28] sm:$0xff] }
 0xed4   :  { %v3358_v18 = vpop.eup %3357 }
 0xed5   :  { %v1595_v19 = vmul.f32 %v3358_v18, %v3472_v20  ;;  %v1885_v18 = vld [vmem:[%s3962_s4 + $0x30] sm:$0xff] }
 0xed7   :  { %v1596_v21 = vadd.f32 %v1595_v19, %v3475_v26 }
 0xed9   :  { %1599 = vrot.lane.b32.xlu1 %v1596_v21, %s3387_s10  ;;  %v1597_v31 = vmul.f32 %v1596_v21, %v3742_v47 }
 0xf39   :  { %v1433_v22 = vpop.permute.xlu0 %1432 }
 0xf3a   :  { %v1435_v23 = vmul.f32 %v1433_v22, %v1429_v17  ;;  %v1886_v22 = vld [vmem:[%s3962_s4 + $0x38] sm:$0xff] }
 0xf3c   :  { %1437 = vrot.lane.b32.xlu0 %v1435_v23, %s3388_s11 }
 0xf4b   :  { %v1600_v24 = vpop.permute.xlu1 %1599 }
 0xf4c   :  { %v1602_v25 = vmul.f32 %v1600_v24, %v1596_v21  ;;  %v3263_v24 = vpack.c.bf16 %v1886_v22, %v1885_v18 }
 0xf4e   :  { %1604 = vrot.lane.b32.xlu1 %v1602_v25, %s3388_s11 }
 0xfae   :  { %v1438_v28 = vpop.permute.xlu0 %1437 }
 0xfaf   :  { %v1440_v29 = vadd.f32 %v1438_v28, %v1430_v27 }
 0xfb1   :  { %3359 = vtanh.f32 %v1440_v29 }
 0xfbb   :  { %v3360_v30 = vpop.eup %3359 }
 0xfbc   :  { %1443 = vrot.lane.b32.xlu0 %v3360_v30, %s3387_s10 }
 0xfc0   :  { %v1605_v32 = vpop.permute.xlu1 %1604 }
 0xfc1   :  { %v1607_v52 = vadd.f32 %v1605_v32, %v1597_v31 }
 0xfc3   :  { %3361 = vtanh.f32 %v1607_v52 }
 0xfcd   :  { %v3362_v34 = vpop.eup %3361 }
 0xfce   :  { %1610 = vrot.lane.b32.xlu1 %v3362_v34, %s3387_s10 }
0x102e   :  { %v1444_v35 = vpop.permute.xlu0 %1443 }
0x102f   :  { %v1446_v36 = vmul.f32 %v1444_v35, %v1429_v17 }
0x1031   :  { %1620 = vrot.lane.b32.xlu0 %v1446_v36, %s3388_s11 }
0x1040   :  { %v1611_v37 = vpop.permute.xlu1 %1610 }
0x1041   :  { %v1613_v38 = vmul.f32 %v1611_v37, %v1596_v21  ;;  %v3260_v21 = vpack.c.bf16 %v1884_v51, %v1883_v16 }
0x1043   :  { %1717 = vrot.lane.b32.xlu1 %v1613_v38, %s3388_s11 }
0x10a3   :  { %v1621_v33 = vpop.permute.xlu0 %1620 }
0x10a4   :  { %3018 = vmatmul.mubr.msk.f32.vlgmr.msra.gmra.mrb[22].mxu0 %vm198_vm5, %v1621_v33 }
0x10a5   :  { %3255 = vmatpush3.bf16.msra.mxu0 %v3553_v55  ;;  %3039 = vmatprep.mubr.msk.f32.mxu0 %vm3384_vm1, %v3385_v4 }
0x10a6   :  { %3256 = vmatprep.subr.bf16.mxu0 %v3383_v0 }
0x10a9   :  { %3258 = vmatpush3.bf16.msra.mxu0 %v3563_v59 }
0x10aa   :  { %3265 = vmatprep.subr.bf16.mxu0 %v3383_v0 }
0x10ac   :  { %3040 = vmatmul.mubr.msk.f32.vlgmr.msra.gmra.mrb[24].mxu0 %vm198_vm5, %v1621_v33 }
0x10ad   :  { %3267 = vmatpush3.bf16.msra.mxu0 %v3440_v9  ;;  %3061 = vmatprep.mubr.msk.f32.mxu0 %vm3384_vm1, %v3385_v4  ;;  %v181_v9 = vadd.f32 %v3467_v15, %v3579_v61 }
0x10ae   :  { %3268 = vmatprep.subr.bf16.mxu0 %v3383_v0 }
0x10b1   :  { %3270 = vmatpush3.bf16.msra.mxu0 %v3446_v11 }
0x10b2   :  { %3277 = vmatprep.subr.bf16.mxu0 %v3383_v0 }
0x10b5   :  { %v3802_v40 = vpop.permute.xlu1 %1717 }
0x10b6   :  { %3029 = vmatmul.mubr.msk.f32.vlgmr.msra.gmra.mrb[18].mxu1 %vm198_vm5, %v3802_v40 }
0x10b7   :  { %3050 = vmatprep.mubr.msk.f32.mxu1 %vm3384_vm1, %v3385_v4  ;;  %3261 = vmatpush3.bf16.msra.mxu1 %v3260_v21 }
0x10b8   :  { %3262 = vmatprep.subr.bf16.mxu1 %v3383_v0 }
0x10bb   :  { %3264 = vmatpush3.bf16.msra.mxu1 %v3263_v24 }
0x10bc   :  { %3271 = vmatprep.subr.bf16.mxu1 %v3383_v0 }
0x1177   :  { %v1690_v41 = vpop.f32.mrb[22].mxu0 }
0x1178   :  { %v1694_v42 = vadd.f32 %v1690_v41, %v181_v9  ;;  %v3019_v44 = vpop.f32.mrb[23].mxu0 }
0x117a   :  { %v1695_v45 = vmul.f32 %v1694_v42, %v3472_v20 }
0x117c   :  { %3363 = vtanh.f32 %v1695_v45 }
0x117f   :  { %v1857_v11 = vpop.f32.mrb[24].mxu0 }
0x1180   :  { %v3041_v46 = vpop.f32.mrb[25].mxu0 }
0x1186   :  { %v3364_v49 = vpop.eup %3363 }
0x1187   :  { %v1697_v47 = vmul.f32 %v3364_v49, %v3472_v20 }
0x1189   :  { %v1787_v48 = vpop.f32.mrb[18].mxu1  ;;  %v1698_v53 = vadd.f32 %v1697_v47, %v3475_v26 }
0x118a   :  { %v1858_v54 = vadd.f32 %v1857_v11, %v1787_v48  ;;  %v3030_v56 = vpop.f32.mrb[19].mxu1 }
0x118b   :  { %1701 = vrot.lane.b32.xlu0 %v1698_v53, %s3387_s10  ;;  %v1699_v5 = vmul.f32 %v1698_v53, %v1440_v29 }
0x118c   :  { %v1861_v61 = vadd.f32 %v3587_v7, %v1858_v54 }
0x118e   :  { %v1862_v57 = vmul.f32 %v1861_v61, %v3472_v20 }
0x1190   :  { %3365 = vtanh.f32 %v1862_v57 }
0x119a   :  { %v3366_v58 = vpop.eup %3365 }
0x119b   :  { %v1864_v62 = vmul.f32 %v3366_v58, %v3472_v20 }
0x119d   :  { %v1865_v63 = vadd.f32 %v1864_v62, %v3475_v26 }
0x119f   :  { %1868 = vrot.lane.b32.xlu1 %v1865_v63, %s3387_s10  ;;  %v1866_v12 = vmul.f32 %v1865_v63, %v1607_v52 }
0x11fd   :  { %v1702_v1 = vpop.permute.xlu0 %1701 }
0x11fe   :  { %v1704_v2 = vmul.f32 %v1702_v1, %v1698_v53 }
0x1200   :  { %1706 = vrot.lane.b32.xlu0 %v1704_v2, %s3388_s11 }
0x1211   :  { %v1869_v50 = vpop.permute.xlu1 %1868 }
0x1212   :  { %v1871_v3 = vmul.f32 %v1869_v50, %v1865_v63  ;;  %v1614_v50 = vld [vmem:[%s3962_s4] sm:$0xff] }
0x1214   :  { %1873 = vrot.lane.b32.xlu1 %v1871_v3, %s3388_s11  ;;  %v1615_v3 = vld [vmem:[%s3962_s4 + $0x8] sm:$0xff] }
0x1272   :  { %v1707_v6 = vpop.permute.xlu0 %1706 }
0x1273   :  { %v3821_v8 = vadd.f32 %v1707_v6, %v1699_v5  ;;  %v3302_v5 = vpack.c.bf16 %v1615_v3, %v1614_v50  ;;  %v1616_v6 = vld [vmem:[%s3962_s4 + $0x10] sm:$0xff] }
0x1275   :  { %3367 = vtanh.f32 %v3821_v8 }
0x127f   :  { %v3368_v10 = vpop.eup %3367 }
0x1280   :  { %1712 = vrot.lane.b32.xlu0 %v3368_v10, %s3387_s10 }
0x1286   :  { %v1874_v13 = vpop.permute.xlu1 %1873 }
0x1287   :  { %v3825_v14 = vadd.f32 %v1874_v13, %v1866_v12 }
0x1289   :  { %3369 = vtanh.f32 %v3825_v14 }
0x1293   :  { %v3370_v17 = vpop.eup %3369 }
0x1294   :  { %1879 = vrot.lane.b32.xlu1 %v3370_v17, %s3387_s10 }
0x12f2   :  { %v1713_v19 = vpop.permute.xlu0 %1712 }
0x12f3   :  { %v1715_v23 = vmul.f32 %v1713_v19, %v1698_v53 }
0x12f5   :  { %1964 = vrot.lane.b32.xlu1 %v1715_v23, %s3388_s11 }
0x1306   :  { %v1880_v25 = vpop.permute.xlu1 %1879 }
0x1307   :  { %v1882_v27 = vmul.f32 %v1880_v25, %v1865_v63 }
0x1309   :  { %1888 = vrot.lane.b32.xlu0 %v1882_v27, %s3388_s11 }
0x1367   :  { %v1965_v28 = vpop.permute.xlu1 %1964 }
0x1368   :  { %3062 = vmatmul.mubr.msk.f32.vlgmr.msra.gmra.mrb[26].mxu0 %vm198_vm5, %v1965_v28 }
0x1369   :  { %3279 = vmatpush3.bf16.msra.mxu0 %v3553_v55  ;;  %3083 = vmatprep.mubr.msk.f32.mxu0 %vm3384_vm1, %v3385_v4 }
0x136a   :  { %3280 = vmatprep.subr.bf16.mxu0 %v3383_v0 }
0x136d   :  { %3282 = vmatpush3.bf16.msra.mxu0 %v3563_v59 }
0x136e   :  { %3289 = vmatprep.subr.bf16.mxu0 %v3383_v0 }
0x1370   :  { %3084 = vmatmul.mubr.msk.f32.vlgmr.msra.gmra.mrb[28].mxu0 %vm198_vm5, %v1965_v28 }
0x1371   :  { %3291 = vmatpush3.bf16.msra.mxu0 %v3553_v55  ;;  %3105 = vmatprep.mubr.msk.f32.mxu0 %vm3384_vm1, %v3385_v4  ;;  %v186_v55 = vadd.f32 %v3577_v60, %v3467_v15 }
0x1372   :  { %3292 = vmatprep.subr.bf16.mxu0 %v3383_v0 }
0x1375   :  { %3294 = vmatpush3.bf16.msra.mxu0 %v3563_v59 }
0x1376   :  { %3301 = vmatprep.subr.bf16.mxu0 %v3383_v0 }
0x137b   :  { %v1889_v29 = vpop.permute.xlu0 %1888 }
0x137c   :  { %3051 = vmatmul.mubr.msk.f32.vlgmr.msra.gmra.mrb[20].mxu1 %vm198_vm5, %v1889_v29 }
0x137d   :  { %3273 = vmatpush3.bf16.msra.mxu1 %v3500_v39  ;;  %3072 = vmatprep.mubr.msk.f32.mxu1 %vm3384_vm1, %v3385_v4 }
0x137e   :  { %3274 = vmatprep.subr.bf16.mxu1 %v3383_v0 }
0x1381   :  { %3276 = vmatpush3.bf16.msra.mxu1 %v3514_v43 }
0x1382   :  { %3283 = vmatprep.subr.bf16.mxu1 %v3383_v0 }
0x1384   :  { %3073 = vmatmul.mubr.msk.f32.vlgmr.msra.gmra.mrb[22].mxu1 %vm198_vm5, %v1889_v29 }
0x1385   :  { %3285 = vmatpush3.bf16.msra.mxu1 %v3500_v39  ;;  %3094 = vmatprep.mubr.msk.f32.mxu1 %vm3384_vm1, %v3385_v4 }
0x1386   :  { %3286 = vmatprep.subr.bf16.mxu1 %v3383_v0 }
0x1389   :  { %3288 = vmatpush3.bf16.msra.mxu1 %v3514_v43 }
0x138a   :  { %3295 = vmatprep.subr.bf16.mxu1 %v3383_v0 }
0x143b   :  { %v2034_v59 = vpop.f32.mrb[26].mxu0 }
0x143c   :  { %v2038_v30 = vadd.f32 %v2034_v59, %v186_v55  ;;  %v3063_v31 = vpop.f32.mrb[27].mxu0 }
0x143e   :  { %v2039_v32 = vmul.f32 %v2038_v30, %v3472_v20 }
0x1440   :  { %3371 = vtanh.f32 %v2039_v32  ;;  %v2401_v32 = vld [vmem:[%s3962_s4 + $0x78] sm:$0xff] }
0x1443   :  { %v2196_v52 = vpop.f32.mrb[28].mxu0 }
0x1444   :  { %v3085_v39 = vpop.f32.mrb[29].mxu0 }
0x144a   :  { %v3372_v34 = vpop.eup %3371 }
0x144b   :  { %v2041_v35 = vmul.f32 %v3372_v34, %v3472_v20 }
0x144d   :  { %v2042_v36 = vadd.f32 %v2041_v35, %v3475_v26 }
0x144f   :  { %v1958_v37 = vpop.f32.mrb[20].mxu1  ;;  %2045 = vrot.lane.b32.xlu0 %v2042_v36, %s3387_s10  ;;  %v2043_v47 = vmul.f32 %v2042_v36, %v3821_v8  ;;  %v1617_v8 = vld [vmem:[%s3962_s4 + $0x18] sm:$0xff] }
0x1450   :  { %v3052_v43 = vpop.f32.mrb[21].mxu1  ;;  %v3305_v12 = vpack.c.bf16 %v1617_v8, %v1616_v6 }
0x1457   :  { %v2126_v38 = vpop.f32.mrb[22].mxu1 }
0x1458   :  { %v2197_v33 = vadd.f32 %v2196_v52, %v2126_v38  ;;  %v3074_v15 = vpop.f32.mrb[23].mxu1  ;;  %v2224_v38 = vld [vmem:[%s3962_s4 + $0x50] sm:$0xff] }
0x145a   :  { %v2200_v60 = vadd.f32 %v3587_v7, %v2197_v33  ;;  %v2225_v33 = vld [vmem:[%s3962_s4 + $0x58] sm:$0xff] }
0x145c   :  { %v2201_v9 = vmul.f32 %v2200_v60, %v3472_v20  ;;  %v3311_v60 = vpack.c.bf16 %v2225_v33, %v2224_v38 }
0x145e   :  { %3373 = vtanh.f32 %v2201_v9 }
0x1468   :  { %v3374_v41 = vpop.eup %3373 }
0x1469   :  { %v2203_v42 = vmul.f32 %v3374_v41, %v3472_v20 }
0x146b   :  { %v2204_v44 = vadd.f32 %v2203_v42, %v3475_v26 }
0x146d   :  { %2207 = vrot.lane.b32.xlu1 %v2204_v44, %s3387_s10  ;;  %v2205_v56 = vmul.f32 %v2204_v44, %v3825_v14 }
0x14c1   :  { %v2046_v45 = vpop.permute.xlu0 %2045 }
0x14c2   :  { %v2048_v11 = vmul.f32 %v2046_v45, %v2042_v36 }
0x14c4   :  { %2050 = vrot.lane.b32.xlu0 %v2048_v11, %s3388_s11  ;;  %v2666_v11 = vld [vmem:[%s3962_s4 + $0x80] ss:$0 sm:$0xff] }
0x14df   :  { %v2208_v46 = vpop.permute.xlu1 %2207 }
0x14e0   :  { %v2210_v49 = vmul.f32 %v2208_v46, %v2204_v44 }
0x14e2   :  { %2212 = vrot.lane.b32.xlu1 %v2210_v49, %s3388_s11 }
0x1536   :  { %v2051_v48 = vpop.permute.xlu0 %2050 }
0x1537   :  { %v2053_v53 = vadd.f32 %v2051_v48, %v2043_v47 }
0x1539   :  { %3375 = vtanh.f32 %v2053_v53 }
0x1543   :  { %v3376_v54 = vpop.eup %3375 }
0x1544   :  { %2056 = vrot.lane.b32.xlu0 %v3376_v54, %s3387_s10 }
0x1554   :  { %v2213_v61 = vpop.permute.xlu1 %2212 }
0x1555   :  { %v2215_v57 = vadd.f32 %v2213_v61, %v2205_v56 }
0x1557   :  { %3377 = vtanh.f32 %v2215_v57 }
0x1561   :  { %v3378_v58 = vpop.eup %3377 }
0x1562   :  { %2218 = vrot.lane.b32.xlu1 %v3378_v58, %s3387_s10 }
0x15b6   :  { %v2057_v62 = vpop.permute.xlu0 %2056 }
0x15b7   :  { %v2059_v63 = vmul.f32 %v2057_v62, %v2042_v36  ;;  %v2222_v36 = vld [vmem:[%s3962_s4 + $0x40] sm:$0xff] }
0x15b9   :  { %2302 = vrot.lane.b32.xlu1 %v2059_v63, %s3388_s11 }
0x15d4   :  { %v2219_v1 = vpop.permute.xlu1 %2218 }
0x15d5   :  { %v2221_v2 = vmul.f32 %v2219_v1, %v2204_v44 }
0x15d7   :  { %2227 = vrot.lane.b32.xlu0 %v2221_v2, %s3388_s11 }
0x162b   :  { %v2303_v10 = vpop.permute.xlu1 %2302 }
0x162c   :  { %3106 = vmatmul.mubr.msk.f32.vlgmr.msra.gmra.mrb[30].mxu0 %vm198_vm5, %v2303_v10 }
0x162d   :  { %3303 = vmatpush3.bf16.msra.mxu0 %v3302_v5  ;;  %3127 = vmatprep.mubr.msk.f32.mxu0 %vm3384_vm1, %v3385_v4 }
0x162e   :  { %3304 = vmatprep.subr.bf16.mxu0 %v3383_v0 }
0x1631   :  { %3306 = vmatpush3.bf16.msra.mxu0 %v3305_v12 }
0x1634   :  { %3128 = vmatmul.mubr.msk.f32.vlgmr.msra.gmra.mrb[32].mxu0 %vm198_vm5, %v3802_v40 }
0x1649   :  { %v2228_v13 = vpop.permute.xlu0 %2227 }
0x164a   :  { %3095 = vmatmul.mubr.msk.f32.vlgmr.msra.gmra.mrb[24].mxu1 %vm198_vm5, %v2228_v13 }
0x164b   :  { %3116 = vmatprep.mubr.msk.f32.mxu1 %vm3384_vm1, %v3385_v4 }
0x16ff   :  { %v2372_v14 = vpop.f32.mrb[30].mxu0 }
0x1700   :  { %v3107_v17 = vpop.f32.mrb[31].mxu0 }
0x1707   :  { %v2543_v16 = vpop.f32.mrb[32].mxu0 }
0x1708   :  { %v2544_v51 = vadd.f32 %v2543_v16, %v1958_v37  ;;  %v3129_v18 = vpop.f32.mrb[33].mxu0  ;;  %v2223_v37 = vld [vmem:[%s3962_s4 + $0x48] sm:$0xff] }
0x1709   :  { %v3308_v43 = vpack.c.bf16 %v2223_v37, %v2222_v36 }
0x171d   :  { %v2297_v19 = vpop.f32.mrb[24].mxu1 }
0x171e   :  { %v2373_v21 = vadd.f32 %v2372_v14, %v2297_v19  ;;  %v3096_v22 = vpop.f32.mrb[25].mxu1 }
0x1720   :  { %v2376_v23 = vadd.f32 %v3587_v7, %v2373_v21  ;;  %v2398_v7 = vld [vmem:[%s3962_s4 + $0x60] sm:$0xff] }
0x1722   :  { %v2377_v24 = vmul.f32 %v2376_v23, %v3472_v20 }
0x1724   :  { %3379 = vtanh.f32 %v2377_v24 }
0x172e   :  { %v3380_v40 = vpop.eup %3379 }
0x172f   :  { %v2379_v25 = vmul.f32 %v3380_v40, %v3472_v20  ;;  %v2399_v20 = vld [vmem:[%s3962_s4 + $0x68] sm:$0xff] }
0x1730   :  { %v3296_v31 = vpack.c.bf16 %v2399_v20, %v2398_v7 }
0x1731   :  { %v2380_v27 = vadd.f32 %v2379_v25, %v3475_v26  ;;  %v2400_v26 = vld [vmem:[%s3962_s4 + $0x70] sm:$0xff] }
0x1732   :  { %3297 = vmatpush3.bf16.msra.mxu1 %v3296_v31  ;;  %v3299_v52 = vpack.c.bf16 %v2401_v32, %v2400_v26 }
0x1733   :  { %2383 = vrot.lane.b32.xlu0 %v2380_v27, %s3387_s10  ;;  %v2381_v55 = vmul.f32 %v2380_v27, %v2215_v57  ;;  %3298 = vmatprep.subr.bf16.mxu1 %v3383_v0 }
0x1736   :  { %3300 = vmatpush3.bf16.msra.mxu1 %v3299_v52 }
0x1737   :  { %3307 = vmatprep.subr.bf16.mxu1 %v3383_v0 }
0x17a5   :  { %v2384_v28 = vpop.permute.xlu0 %2383 }
0x17a6   :  { %v2386_v29 = vmul.f32 %v2384_v28, %v2380_v27 }
0x17a8   :  { %2388 = vrot.lane.b32.xlu1 %v2386_v29, %s3388_s11 }
0x181a   :  { %v2389_v59 = vpop.permute.xlu1 %2388 }
0x181b   :  { %v2391_v30 = vadd.f32 %v2389_v59, %v2381_v55 }
0x181d   :  { %3381 = vtanh.f32 %v2391_v30 }
0x1827   :  { %v3382_v39 = vpop.eup %3381 }
0x1828   :  { %2394 = vrot.lane.b32.xlu0 %v3382_v39, %s3387_s10 }
0x189a   :  { %v2395_v34 = vpop.permute.xlu0 %2394 }
0x189b   :  { %v2397_v35 = vmul.f32 %v2395_v34, %v2380_v27 }
0x189d   :  { %2403 = vrot.lane.b32.xlu1 %v2397_v35, %s3388_s11 }
0x190f   :  { %v2404_v15 = vpop.permute.xlu1 %2403 }
0x1910   :  { %3117 = vmatmul.mubr.msk.f32.vlgmr.msra.gmra.mrb[26].mxu1 %vm198_vm5, %v2404_v15 }
0x1911   :  { %3309 = vmatpush3.bf16.msra.mxu1 %v3308_v43  ;;  %3138 = vmatprep.mubr.msk.f32.mxu1 %vm3384_vm1, %v3385_v4 }
0x1912   :  { %3310 = vmatprep.subr.bf16.mxu1 %v3383_v0 }
0x1915   :  { %3312 = vmatpush3.bf16.msra.mxu1 %v3311_v60 }
0x1918   :  { %3139 = vmatmul.mubr.msk.f32.vlgmr.msra.gmra.mrb[28].mxu1 %vm198_vm5, %v2228_v13 }
0x19e3   :  { %v2473_v9 = vpop.f32.mrb[26].mxu1 }
0x19e4   :  { %v3118_v41 = vpop.f32.mrb[27].mxu1 }
0x19eb   :  { %v2613_v42 = vpop.f32.mrb[28].mxu1 }
0x19ec   :  { %v2614_v44 = vadd.f32 %v2613_v42, %v2473_v9  ;;  %v3140_v45 = vpop.f32.mrb[29].mxu1 }
0x19ee   :  { %v2617_v46 = vadd.f32 %v2614_v44, %v2544_v51 }
0x19f0   :  { %v2623_v49 = vadd.f32 %v2666_v11, %v2617_v46 }
0x19f2   :  { %2625 = vst.msk [vmem:[%s3963_s5] sm:$0xff] %vm2624_vm6, %v2623_v49 }

</bundles_post_ra>
